<compile_context>
chip_gen: v6e
topology: v6e:2x2x1
jax: 0.10.0
libtpu: 0.0.40
codegen_flags: <defaults>
</compile_context>

<pallas_src>
import math

import jax
import jax.numpy as jnp
import numpy as np
from jax.experimental import pallas as pl
from jax.experimental.pallas import tpu as pltpu


def _make_inception_kernel(B, C_in, L, nf, K0, K2):
    """Kernel body for fixed static shapes.  K0/K2 are the largest/smallest
    conv kernel sizes (branch 1's kernel is packed into the K0-tap slab
    wrapper-side)."""
    BL = B * L
    p0 = (K0 - 1) // 2
    p2 = (K2 - 1) // 2

    def kernel(x_ref, wb_ref, w0_ref, w1_ref, gamma_ref, beta_ref,
               out_ref, rhs0_ref, rhs1_ref):
        g = pl.program_id(0)
        # position of each lane within its example (batch folded into lanes)
        lpos = jax.lax.broadcasted_iota(jnp.int32, (1, BL), 1) % L

        x = x_ref[...]                                           # (C_in, BL) f32
        # bottleneck 1x1 conv: ONE bf16 MXU matmul over all examples at once
        y = jnp.dot(wb_ref[...], x.astype(jnp.bfloat16),
                    preferred_element_type=jnp.float32)          # (nf, BL) f32

        def tap(v, d):
            # shifted "same"-conv view v[:, j + d]; the roll wraps across
            # example boundaries only where the position mask zeroes it anyway.
            if d == 0:
                return v
            r = pltpu.roll(v, shift=(-d) % BL, axis=1)
            valid = jnp.logical_and(lpos + d >= 0, lpos + d < L)
            return jnp.where(valid, r, jnp.zeros_like(r))

        def bn_relu(feats, gamma, beta):
            # BatchNorm1d (training-mode batch stats, biased variance) + ReLU,
            # one-pass statistics in f32, single fused sweep over feats.
            s1 = jnp.sum(feats, axis=1, keepdims=True)
            s2 = jnp.sum(feats * feats, axis=1, keepdims=True)
            mean = s1 * (1.0 / BL)
            var = s2 * (1.0 / BL) - mean * mean
            a = gamma * jax.lax.rsqrt(var + 1e-5)
            return jnp.maximum(feats * a + (beta - mean * a), 0.0)

        @pl.when(g == 0)
        def _():
            # conv branches 0 (K0 taps) and 1 (K1 taps, zero-padded into the
            # same K0-tap slab wrapper-side) -> one deep MXU matmul.
            for s in range(K0):
                rhs0_ref[s * nf:(s + 1) * nf, :] = (
                    tap(y, s - p0).astype(jnp.bfloat16))
            feats = jnp.dot(w0_ref[...], rhs0_ref[...],
                            preferred_element_type=jnp.float32)  # (2nf, BL)
            out_ref[...] = bn_relu(feats, gamma_ref[0:2 * nf, :],
                                   beta_ref[0:2 * nf, :])

        @pl.when(g == 1)
        def _():
            # conv branch 2 (K2 taps) + maxpool(3,1,1)->1x1 branch.
            for s in range(K2):
                rhs1_ref[s * nf:(s + 1) * nf, :] = (
                    tap(y, s - p2).astype(jnp.bfloat16))
            # maxpool edge trick: substitute the center for the -inf-padded
            # neighbor (equivalent for finite inputs); also blocks bleed
            # across example boundaries introduced by the roll.
            left = jnp.where(lpos >= 1, pltpu.roll(x, shift=1, axis=1), x)
            right = jnp.where(lpos <= L - 2, pltpu.roll(x, shift=BL - 1, axis=1), x)
            pooled = jnp.maximum(x, jnp.maximum(left, right))
            rhs1_ref[K2 * nf:K2 * nf + C_in, :] = pooled.astype(jnp.bfloat16)
            feats = jnp.dot(w1_ref[...], rhs1_ref[...],
                            preferred_element_type=jnp.float32)  # (2nf, BL)
            out_ref[...] = bn_relu(feats, gamma_ref[2 * nf:4 * nf, :],
                                   beta_ref[2 * nf:4 * nf, :])

    return kernel


def _pack_step_weights(w_convs, wp, nf, C_in):
    """Pack per-branch conv weights into the two per-grid-step matmul LHS
    matrices (pure wrapper-side weight preprocessing, bf16)."""
    w0c, w1c, w2c = w_convs                       # (K, nf_out, nf_in), K desc.
    K0, K1, K2 = (int(w.shape[0]) for w in w_convs)
    p0, p1 = (K0 - 1) // 2, (K1 - 1) // 2
    # step 0: branch0 (K0 taps) + branch1 (K1 taps, centered in the K0 slab)
    blk0 = jnp.transpose(w0c, (1, 0, 2)).reshape(nf, K0 * nf)
    blk1 = jnp.transpose(w1c, (1, 0, 2)).reshape(nf, K1 * nf)
    blk1 = jnp.pad(blk1, ((0, 0), ((p0 - p1) * nf, (p0 - p1) * nf)))
    wstep0 = jnp.concatenate([blk0, blk1], axis=0)               # (2nf, K0*nf)
    # step 1: branch2 (K2 taps) + pool 1x1 conv
    blk2 = jnp.pad(jnp.transpose(w2c, (1, 0, 2)).reshape(nf, K2 * nf),
                   ((0, 0), (0, C_in)))
    blkp = jnp.pad(wp, ((0, 0), (K2 * nf, 0)))
    wstep1 = jnp.concatenate([blk2, blkp], axis=0)               # (2nf, K2*nf+C_in)
    return wstep0.astype(jnp.bfloat16), wstep1.astype(jnp.bfloat16)


def inception_forward(x, params):
    """x: (B, C_in, L) f32 -> (B, 4*nf, L) f32."""
    B, C_in, L = x.shape
    nf = params["wb"].shape[0]
    K0, K1, K2 = (int(w.shape[0]) for w in params["w_convs"])
    assert K0 % 2 == 1 and K1 % 2 == 1 and K2 % 2 == 1, "'same' convs need odd K"
    assert K0 >= K1 >= K2
    BL = B * L
    # lane-dense (unmasked vst) stores & output require 128-aligned lane extent
    assert BL % 128 == 0, "pad B*L to a multiple of 128"

    # ---- wrapper-side layout / weight preprocessing (bf16 MXU operands) ----
    x2d = jnp.transpose(x, (1, 0, 2)).reshape(C_in, BL)          # (C_in, B*L)
    wb = params["wb"].astype(jnp.bfloat16)
    w0, w1 = _pack_step_weights(params["w_convs"], params["wp"], nf, C_in)
    gamma2d = params["gamma"].reshape(4 * nf, 1)
    beta2d = params["beta"].reshape(4 * nf, 1)

    kernel = _make_inception_kernel(B, C_in, L, nf, K0, K2)

    def whole(shape):
        # whole-array block with constant index_map: DMA'd once, resident
        # across both grid steps (weights are never re-fetched).
        return pl.BlockSpec(shape, lambda g, s=shape: tuple(0 for _ in s))

    out2d = pl.pallas_call(
        kernel,
        out_shape=jax.ShapeDtypeStruct((4 * nf, BL), jnp.float32),
        grid=(2,),
        in_specs=[
            whole((C_in, BL)),                 # x
            whole((nf, C_in)),                 # bottleneck weight
            whole((2 * nf, K0 * nf)),          # step-0 fused conv weight
            whole((2 * nf, K2 * nf + C_in)),   # step-1 fused conv+pool weight
            whole((4 * nf, 1)),                # gamma
            whole((4 * nf, 1)),                # beta
        ],
        out_specs=pl.BlockSpec((2 * nf, BL), lambda g: (g, 0)),
        scratch_shapes=[
            pltpu.VMEM((K0 * nf, BL), jnp.bfloat16),             # step-0 im2col slab
            pltpu.VMEM((K2 * nf + C_in, BL), jnp.bfloat16),      # step-1 slab + pooled x
        ],
        compiler_params=pltpu.CompilerParams(
            dimension_semantics=("parallel",),
            vmem_limit_bytes=32 * 1024 * 1024,
        ),
    )(x2d, wb, w0, w1, gamma2d, beta2d)

    return jnp.transpose(out2d.reshape(4 * nf, B, L), (1, 0, 2))  # (B, 4nf, L)


def inception_reference(x, params):
    """Plain-JAX f32 reference mirroring PyTorch InceptionModule.forward."""
    B, C_in, L = x.shape
    y = jnp.einsum("oc,bcl->bol", params["wb"], x)               # bottleneck
    feats = []
    for w in params["w_convs"]:                                  # (K, nf, nf)
        K = w.shape[0]
        p = (K - 1) // 2
        yp = jnp.pad(y, ((0, 0), (0, 0), (p, p)))
        acc = jnp.zeros_like(y)
        for t in range(K):
            acc = acc + jnp.einsum("oc,bcl->bol", w[t], yp[:, :, t:t + L])
        feats.append(acc)
    xp = jnp.pad(x, ((0, 0), (0, 0), (1, 1)), constant_values=-jnp.inf)
    pooled = jnp.maximum(jnp.maximum(xp[:, :, :-2], xp[:, :, 1:-1]), xp[:, :, 2:])
    feats.append(jnp.einsum("oc,bcl->bol", params["wp"], pooled))
    f = jnp.concatenate(feats, axis=1)
    mean = jnp.mean(f, axis=(0, 2), keepdims=True)
    var = jnp.mean((f - mean) ** 2, axis=(0, 2), keepdims=True)
    f = (f - mean) / jnp.sqrt(var + 1e-5)
    f = f * params["gamma"][None, :, None] + params["beta"][None, :, None]
    return jnp.maximum(f, 0.0)


def make_params(key, C_in, nf, kernel_size):
    # kernel_size_s = [ks // 2**i for i in range(3)], conv kernel = ks_i + 1
    conv_ks = [kernel_size // (2 ** i) + 1 for i in range(3)]
    keys = jax.random.split(key, 7)
    wb = jax.random.normal(keys[0], (nf, C_in), jnp.float32) / math.sqrt(C_in)
    w_convs = tuple(
        jax.random.normal(keys[1 + i], (k, nf, nf), jnp.float32) / math.sqrt(nf * k)
        for i, k in enumerate(conv_ks)
    )
    wp = jax.random.normal(keys[4], (nf, C_in), jnp.float32) / math.sqrt(C_in)
    gamma = 1.0 + 0.1 * jax.random.normal(keys[5], (4 * nf,), jnp.float32)
    beta = 0.1 * jax.random.normal(keys[6], (4 * nf,), jnp.float32)
    return {"wb": wb, "w_convs": w_convs, "wp": wp, "gamma": gamma, "beta": beta}


if __name__ == "__main__":
    # Small shapes consistent with the module (use_bias=False, residual=False).
    B, C_in, L = 2, 16, 128
    nf, KS = 16, 8                       # kernel_size=8 -> conv kernels 9, 5, 3

    root = jax.random.PRNGKey(0)
    pkey, xkey = jax.random.split(root)
    params = make_params(pkey, C_in, nf, KS)
    x = jax.random.normal(xkey, (B, C_in, L), jnp.float32)

    out = jax.block_until_ready(jax.jit(inception_forward)(x, params))
    ref = jax.block_until_ready(inception_reference(x, params))

    assert out.shape == (B, 4 * nf, L)
    # tolerance accounts for bf16 MXU operands (f32 accumulation)
    np.testing.assert_allclose(np.asarray(out), np.asarray(ref),
                               rtol=2.5e-2, atol=2.5e-2)
    print("KERNEL_OK")
</pallas_src>

<mosaic_0001>
module attributes {stable_mosaic.version = 11 : i64} {
  func.func @kernel(%arg0: i32, %arg1: memref<16x256xf32, #tpu.memory_space<vmem>>, %arg2: memref<16x16xbf16, #tpu.memory_space<vmem>>, %arg3: memref<32x144xbf16, #tpu.memory_space<vmem>>, %arg4: memref<32x64xbf16, #tpu.memory_space<vmem>>, %arg5: memref<64x1xf32, #tpu.memory_space<vmem>>, %arg6: memref<64x1xf32, #tpu.memory_space<vmem>>, %arg7: memref<32x256xf32, #tpu.memory_space<vmem>>, %arg8: memref<144x256xbf16, #tpu.memory_space<vmem>>, %arg9: memref<64x256xbf16, #tpu.memory_space<vmem>>) attributes {dimension_semantics = [#tpu.dimension_semantics<parallel>], iteration_bounds = array<i64: 2>, scalar_prefetch = 0 : i64, scratch_operands = 2 : i64, tpu.core_type = #tpu.core_type<tc>, window_params = [{pipeline_mode = #tpu.pipeline_mode<synchronous>, transform_indices = @transform_0, window_bounds = array<i64: 16, 256>}, {pipeline_mode = #tpu.pipeline_mode<synchronous>, transform_indices = @transform_1, window_bounds = array<i64: 16, 16>}, {pipeline_mode = #tpu.pipeline_mode<synchronous>, transform_indices = @transform_2, window_bounds = array<i64: 32, 144>}, {pipeline_mode = #tpu.pipeline_mode<synchronous>, transform_indices = @transform_3, window_bounds = array<i64: 32, 64>}, {pipeline_mode = #tpu.pipeline_mode<synchronous>, transform_indices = @transform_4, window_bounds = array<i64: 64, 1>}, {pipeline_mode = #tpu.pipeline_mode<synchronous>, transform_indices = @transform_5, window_bounds = array<i64: 64, 1>}, {transform_indices = @transform_6, window_bounds = array<i64: 32, 256>}]} {
    %0 = tpu.iota {dimensions = array<i32: 1>} : vector<1x256xi32>
    %c128_i32 = arith.constant 128 : i32
    %c0_i32 = arith.constant 0 : i32
    %1 = arith.cmpi eq, %c128_i32, %c0_i32 : i32
    %c1_i32 = arith.constant 1 : i32
    %2 = arith.select %1, %c1_i32, %c128_i32 : i32
    %3 = vector.broadcast %2 : i32 to vector<1x256xi32>
    %4 = arith.remsi %0, %3 : vector<1x256xi32>
    %c0_i32_0 = arith.constant 0 : i32
    %5 = vector.broadcast %c0_i32_0 : i32 to vector<1x256xi32>
    %6 = arith.cmpi ne, %4, %5 : vector<1x256xi32>
    %c0_i32_1 = arith.constant 0 : i32
    %7 = vector.broadcast %c0_i32_1 : i32 to vector<1x256xi32>
    %8 = arith.cmpi slt, %4, %7 : vector<1x256xi32>
    %c0_i32_2 = arith.constant 0 : i32
    %9 = arith.cmpi slt, %2, %c0_i32_2 : i32
    %10 = vector.broadcast %9 : i1 to vector<1x256xi1>
    %11 = vector.broadcast %10 : vector<1x256xi1> to vector<1x256xi1>
    %12 = arith.xori %8, %11 : vector<1x256xi1>
    %13 = arith.andi %12, %6 : vector<1x256xi1>
    %14 = vector.broadcast %2 : i32 to vector<1x256xi32>
    %15 = arith.addi %4, %14 : vector<1x256xi32>
    %16 = arith.select %13, %15, %4 : vector<1x256xi1>, vector<1x256xi32>
    %c0 = arith.constant 0 : index
    %c0_3 = arith.constant 0 : index
    %17 = vector.load %arg1[%c0, %c0_3] : memref<16x256xf32, #tpu.memory_space<vmem>>, vector<16x256xf32>
    %c0_4 = arith.constant 0 : index
    %c0_5 = arith.constant 0 : index
    %18 = vector.load %arg2[%c0_4, %c0_5] : memref<16x16xbf16, #tpu.memory_space<vmem>>, vector<16x16xbf16>
    %19 = arith.truncf %17 : vector<16x256xf32> to vector<16x256xbf16>
    %cst = arith.constant dense<0.000000e+00> : vector<16x256xf32>
    %20 = tpu.matmul %18, %19, %cst {dimension_numbers = #tpu.dot_dimension_numbers<[1], [0], [0], [1], [0, 0, 1, 1], [], []>} : vector<16x16xbf16>, vector<16x256xbf16>, vector<16x256xf32> -> vector<16x256xf32>
    %c0_i32_6 = arith.constant 0 : i32
    %21 = arith.cmpi eq, %arg0, %c0_i32_6 : i32
    %22 = arith.extui %21 : i1 to i32
    %c0_i32_7 = arith.constant 0 : i32
    %23 = arith.cmpi ne, %22, %c0_i32_7 : i32
    scf.if %23 {
      %c4_i32 = arith.constant 4 : i32
      %27 = tpu.dynamic_rotate %20 by %c4_i32 dim 1 : vector<16x256xf32>, i32 -> vector<16x256xf32>
      %c-4_i32 = arith.constant -4 : i32
      %28 = vector.broadcast %c-4_i32 : i32 to vector<1x256xi32>
      %29 = arith.addi %16, %28 : vector<1x256xi32>
      %c0_i32_10 = arith.constant 0 : i32
      %30 = vector.broadcast %c0_i32_10 : i32 to vector<1x256xi32>
      %31 = arith.cmpi sge, %29, %30 : vector<1x256xi32>
      %c-4_i32_11 = arith.constant -4 : i32
      %32 = vector.broadcast %c-4_i32_11 : i32 to vector<1x256xi32>
      %33 = arith.addi %16, %32 : vector<1x256xi32>
      %c128_i32_12 = arith.constant 128 : i32
      %34 = vector.broadcast %c128_i32_12 : i32 to vector<1x256xi32>
      %35 = arith.cmpi slt, %33, %34 : vector<1x256xi32>
      %36 = arith.andi %31, %35 : vector<1x256xi1>
      %cst_13 = arith.constant 0.000000e+00 : f32
      %37 = vector.broadcast %cst_13 : f32 to vector<16x256xf32>
      %38 = vector.shape_cast %36 : vector<1x256xi1> to vector<1x256xi1>
      %39 = vector.broadcast %38 : vector<1x256xi1> to vector<16x256xi1>
      %40 = arith.select %39, %27, %37 : vector<16x256xi1>, vector<16x256xf32>
      %41 = arith.truncf %40 : vector<16x256xf32> to vector<16x256xbf16>
      %c0_14 = arith.constant 0 : index
      %c0_15 = arith.constant 0 : index
      %42 = vector.load %arg8[%c0_14, %c0_15] : memref<144x256xbf16, #tpu.memory_space<vmem>>, vector<16x256xbf16>
      tpu.vector_store %arg8[%c0_14, %c0_15], %41 {strides = array<i32>} : memref<144x256xbf16, #tpu.memory_space<vmem>>, vector<16x256xbf16>,
      %c3_i32 = arith.constant 3 : i32
      %43 = tpu.dynamic_rotate %20 by %c3_i32 dim 1 : vector<16x256xf32>, i32 -> vector<16x256xf32>
      %c-3_i32 = arith.constant -3 : i32
      %44 = vector.broadcast %c-3_i32 : i32 to vector<1x256xi32>
      %45 = arith.addi %16, %44 : vector<1x256xi32>
      %c0_i32_16 = arith.constant 0 : i32
      %46 = vector.broadcast %c0_i32_16 : i32 to vector<1x256xi32>
      %47 = arith.cmpi sge, %45, %46 : vector<1x256xi32>
      %c-3_i32_17 = arith.constant -3 : i32
      %48 = vector.broadcast %c-3_i32_17 : i32 to vector<1x256xi32>
      %49 = arith.addi %16, %48 : vector<1x256xi32>
      %c128_i32_18 = arith.constant 128 : i32
      %50 = vector.broadcast %c128_i32_18 : i32 to vector<1x256xi32>
      %51 = arith.cmpi slt, %49, %50 : vector<1x256xi32>
      %52 = arith.andi %47, %51 : vector<1x256xi1>
      %cst_19 = arith.constant 0.000000e+00 : f32
      %53 = vector.broadcast %cst_19 : f32 to vector<16x256xf32>
      %54 = vector.shape_cast %52 : vector<1x256xi1> to vector<1x256xi1>
      %55 = vector.broadcast %54 : vector<1x256xi1> to vector<16x256xi1>
      %56 = arith.select %55, %43, %53 : vector<16x256xi1>, vector<16x256xf32>
      %57 = arith.truncf %56 : vector<16x256xf32> to vector<16x256xbf16>
      %c16 = arith.constant 16 : index
      %c0_20 = arith.constant 0 : index
      %58 = vector.load %arg8[%c16, %c0_20] : memref<144x256xbf16, #tpu.memory_space<vmem>>, vector<16x256xbf16>
      tpu.vector_store %arg8[%c16, %c0_20], %57 {strides = array<i32>} : memref<144x256xbf16, #tpu.memory_space<vmem>>, vector<16x256xbf16>,
      %c2_i32 = arith.constant 2 : i32
      %59 = tpu.dynamic_rotate %20 by %c2_i32 dim 1 : vector<16x256xf32>, i32 -> vector<16x256xf32>
      %c-2_i32 = arith.constant -2 : i32
      %60 = vector.broadcast %c-2_i32 : i32 to vector<1x256xi32>
      %61 = arith.addi %16, %60 : vector<1x256xi32>
      %c0_i32_21 = arith.constant 0 : i32
      %62 = vector.broadcast %c0_i32_21 : i32 to vector<1x256xi32>
      %63 = arith.cmpi sge, %61, %62 : vector<1x256xi32>
      %c-2_i32_22 = arith.constant -2 : i32
      %64 = vector.broadcast %c-2_i32_22 : i32 to vector<1x256xi32>
      %65 = arith.addi %16, %64 : vector<1x256xi32>
      %c128_i32_23 = arith.constant 128 : i32
      %66 = vector.broadcast %c128_i32_23 : i32 to vector<1x256xi32>
      %67 = arith.cmpi slt, %65, %66 : vector<1x256xi32>
      %68 = arith.andi %63, %67 : vector<1x256xi1>
      %cst_24 = arith.constant 0.000000e+00 : f32
      %69 = vector.broadcast %cst_24 : f32 to vector<16x256xf32>
      %70 = vector.shape_cast %68 : vector<1x256xi1> to vector<1x256xi1>
      %71 = vector.broadcast %70 : vector<1x256xi1> to vector<16x256xi1>
      %72 = arith.select %71, %59, %69 : vector<16x256xi1>, vector<16x256xf32>
      %73 = arith.truncf %72 : vector<16x256xf32> to vector<16x256xbf16>
      %c32 = arith.constant 32 : index
      %c0_25 = arith.constant 0 : index
      %74 = vector.load %arg8[%c32, %c0_25] : memref<144x256xbf16, #tpu.memory_space<vmem>>, vector<16x256xbf16>
      tpu.vector_store %arg8[%c32, %c0_25], %73 {strides = array<i32>} : memref<144x256xbf16, #tpu.memory_space<vmem>>, vector<16x256xbf16>,
      %c1_i32_26 = arith.constant 1 : i32
      %75 = tpu.dynamic_rotate %20 by %c1_i32_26 dim 1 : vector<16x256xf32>, i32 -> vector<16x256xf32>
      %c-1_i32 = arith.constant -1 : i32
      %76 = vector.broadcast %c-1_i32 : i32 to vector<1x256xi32>
      %77 = arith.addi %16, %76 : vector<1x256xi32>
      %c0_i32_27 = arith.constant 0 : i32
      %78 = vector.broadcast %c0_i32_27 : i32 to vector<1x256xi32>
      %79 = arith.cmpi sge, %77, %78 : vector<1x256xi32>
      %c-1_i32_28 = arith.constant -1 : i32
      %80 = vector.broadcast %c-1_i32_28 : i32 to vector<1x256xi32>
      %81 = arith.addi %16, %80 : vector<1x256xi32>
      %c128_i32_29 = arith.constant 128 : i32
      %82 = vector.broadcast %c128_i32_29 : i32 to vector<1x256xi32>
      %83 = arith.cmpi slt, %81, %82 : vector<1x256xi32>
      %84 = arith.andi %79, %83 : vector<1x256xi1>
      %cst_30 = arith.constant 0.000000e+00 : f32
      %85 = vector.broadcast %cst_30 : f32 to vector<16x256xf32>
      %86 = vector.shape_cast %84 : vector<1x256xi1> to vector<1x256xi1>
      %87 = vector.broadcast %86 : vector<1x256xi1> to vector<16x256xi1>
      %88 = arith.select %87, %75, %85 : vector<16x256xi1>, vector<16x256xf32>
      %89 = arith.truncf %88 : vector<16x256xf32> to vector<16x256xbf16>
      %c48 = arith.constant 48 : index
      %c0_31 = arith.constant 0 : index
      %90 = vector.load %arg8[%c48, %c0_31] : memref<144x256xbf16, #tpu.memory_space<vmem>>, vector<16x256xbf16>
      tpu.vector_store %arg8[%c48, %c0_31], %89 {strides = array<i32>} : memref<144x256xbf16, #tpu.memory_space<vmem>>, vector<16x256xbf16>,
      %91 = arith.truncf %20 : vector<16x256xf32> to vector<16x256xbf16>
      %c64 = arith.constant 64 : index
      %c0_32 = arith.constant 0 : index
      %92 = vector.load %arg8[%c64, %c0_32] : memref<144x256xbf16, #tpu.memory_space<vmem>>, vector<16x256xbf16>
      tpu.vector_store %arg8[%c64, %c0_32], %91 {strides = array<i32>} : memref<144x256xbf16, #tpu.memory_space<vmem>>, vector<16x256xbf16>,
      %c255_i32 = arith.constant 255 : i32
      %93 = tpu.dynamic_rotate %20 by %c255_i32 dim 1 : vector<16x256xf32>, i32 -> vector<16x256xf32>
      %c1_i32_33 = arith.constant 1 : i32
      %94 = vector.broadcast %c1_i32_33 : i32 to vector<1x256xi32>
      %95 = arith.addi %16, %94 : vector<1x256xi32>
      %c0_i32_34 = arith.constant 0 : i32
      %96 = vector.broadcast %c0_i32_34 : i32 to vector<1x256xi32>
      %97 = arith.cmpi sge, %95, %96 : vector<1x256xi32>
      %c1_i32_35 = arith.constant 1 : i32
      %98 = vector.broadcast %c1_i32_35 : i32 to vector<1x256xi32>
      %99 = arith.addi %16, %98 : vector<1x256xi32>
      %c128_i32_36 = arith.constant 128 : i32
      %100 = vector.broadcast %c128_i32_36 : i32 to vector<1x256xi32>
      %101 = arith.cmpi slt, %99, %100 : vector<1x256xi32>
      %102 = arith.andi %97, %101 : vector<1x256xi1>
      %cst_37 = arith.constant 0.000000e+00 : f32
      %103 = vector.broadcast %cst_37 : f32 to vector<16x256xf32>
      %104 = vector.shape_cast %102 : vector<1x256xi1> to vector<1x256xi1>
      %105 = vector.broadcast %104 : vector<1x256xi1> to vector<16x256xi1>
      %106 = arith.select %105, %93, %103 : vector<16x256xi1>, vector<16x256xf32>
      %107 = arith.truncf %106 : vector<16x256xf32> to vector<16x256xbf16>
      %c80 = arith.constant 80 : index
      %c0_38 = arith.constant 0 : index
      %108 = vector.load %arg8[%c80, %c0_38] : memref<144x256xbf16, #tpu.memory_space<vmem>>, vector<16x256xbf16>
      tpu.vector_store %arg8[%c80, %c0_38], %107 {strides = array<i32>} : memref<144x256xbf16, #tpu.memory_space<vmem>>, vector<16x256xbf16>,
      %c254_i32 = arith.constant 254 : i32
      %109 = tpu.dynamic_rotate %20 by %c254_i32 dim 1 : vector<16x256xf32>, i32 -> vector<16x256xf32>
      %c2_i32_39 = arith.constant 2 : i32
      %110 = vector.broadcast %c2_i32_39 : i32 to vector<1x256xi32>
      %111 = arith.addi %16, %110 : vector<1x256xi32>
      %c0_i32_40 = arith.constant 0 : i32
      %112 = vector.broadcast %c0_i32_40 : i32 to vector<1x256xi32>
      %113 = arith.cmpi sge, %111, %112 : vector<1x256xi32>
      %c2_i32_41 = arith.constant 2 : i32
      %114 = vector.broadcast %c2_i32_41 : i32 to vector<1x256xi32>
      %115 = arith.addi %16, %114 : vector<1x256xi32>
      %c128_i32_42 = arith.constant 128 : i32
      %116 = vector.broadcast %c128_i32_42 : i32 to vector<1x256xi32>
      %117 = arith.cmpi slt, %115, %116 : vector<1x256xi32>
      %118 = arith.andi %113, %117 : vector<1x256xi1>
      %cst_43 = arith.constant 0.000000e+00 : f32
      %119 = vector.broadcast %cst_43 : f32 to vector<16x256xf32>
      %120 = vector.shape_cast %118 : vector<1x256xi1> to vector<1x256xi1>
      %121 = vector.broadcast %120 : vector<1x256xi1> to vector<16x256xi1>
      %122 = arith.select %121, %109, %119 : vector<16x256xi1>, vector<16x256xf32>
      %123 = arith.truncf %122 : vector<16x256xf32> to vector<16x256xbf16>
      %c96 = arith.constant 96 : index
      %c0_44 = arith.constant 0 : index
      %124 = vector.load %arg8[%c96, %c0_44] : memref<144x256xbf16, #tpu.memory_space<vmem>>, vector<16x256xbf16>
      tpu.vector_store %arg8[%c96, %c0_44], %123 {strides = array<i32>} : memref<144x256xbf16, #tpu.memory_space<vmem>>, vector<16x256xbf16>,
      %c253_i32 = arith.constant 253 : i32
      %125 = tpu.dynamic_rotate %20 by %c253_i32 dim 1 : vector<16x256xf32>, i32 -> vector<16x256xf32>
      %c3_i32_45 = arith.constant 3 : i32
      %126 = vector.broadcast %c3_i32_45 : i32 to vector<1x256xi32>
      %127 = arith.addi %16, %126 : vector<1x256xi32>
      %c0_i32_46 = arith.constant 0 : i32
      %128 = vector.broadcast %c0_i32_46 : i32 to vector<1x256xi32>
      %129 = arith.cmpi sge, %127, %128 : vector<1x256xi32>
      %c3_i32_47 = arith.constant 3 : i32
      %130 = vector.broadcast %c3_i32_47 : i32 to vector<1x256xi32>
      %131 = arith.addi %16, %130 : vector<1x256xi32>
      %c128_i32_48 = arith.constant 128 : i32
      %132 = vector.broadcast %c128_i32_48 : i32 to vector<1x256xi32>
      %133 = arith.cmpi slt, %131, %132 : vector<1x256xi32>
      %134 = arith.andi %129, %133 : vector<1x256xi1>
      %cst_49 = arith.constant 0.000000e+00 : f32
      %135 = vector.broadcast %cst_49 : f32 to vector<16x256xf32>
      %136 = vector.shape_cast %134 : vector<1x256xi1> to vector<1x256xi1>
      %137 = vector.broadcast %136 : vector<1x256xi1> to vector<16x256xi1>
      %138 = arith.select %137, %125, %135 : vector<16x256xi1>, vector<16x256xf32>
      %139 = arith.truncf %138 : vector<16x256xf32> to vector<16x256xbf16>
      %c112 = arith.constant 112 : index
      %c0_50 = arith.constant 0 : index
      %140 = vector.load %arg8[%c112, %c0_50] : memref<144x256xbf16, #tpu.memory_space<vmem>>, vector<16x256xbf16>
      tpu.vector_store %arg8[%c112, %c0_50], %139 {strides = array<i32>} : memref<144x256xbf16, #tpu.memory_space<vmem>>, vector<16x256xbf16>,
      %c252_i32 = arith.constant 252 : i32
      %141 = tpu.dynamic_rotate %20 by %c252_i32 dim 1 : vector<16x256xf32>, i32 -> vector<16x256xf32>
      %c4_i32_51 = arith.constant 4 : i32
      %142 = vector.broadcast %c4_i32_51 : i32 to vector<1x256xi32>
      %143 = arith.addi %16, %142 : vector<1x256xi32>
      %c0_i32_52 = arith.constant 0 : i32
      %144 = vector.broadcast %c0_i32_52 : i32 to vector<1x256xi32>
      %145 = arith.cmpi sge, %143, %144 : vector<1x256xi32>
      %c4_i32_53 = arith.constant 4 : i32
      %146 = vector.broadcast %c4_i32_53 : i32 to vector<1x256xi32>
      %147 = arith.addi %16, %146 : vector<1x256xi32>
      %c128_i32_54 = arith.constant 128 : i32
      %148 = vector.broadcast %c128_i32_54 : i32 to vector<1x256xi32>
      %149 = arith.cmpi slt, %147, %148 : vector<1x256xi32>
      %150 = arith.andi %145, %149 : vector<1x256xi1>
      %cst_55 = arith.constant 0.000000e+00 : f32
      %151 = vector.broadcast %cst_55 : f32 to vector<16x256xf32>
      %152 = vector.shape_cast %150 : vector<1x256xi1> to vector<1x256xi1>
      %153 = vector.broadcast %152 : vector<1x256xi1> to vector<16x256xi1>
      %154 = arith.select %153, %141, %151 : vector<16x256xi1>, vector<16x256xf32>
      %155 = arith.truncf %154 : vector<16x256xf32> to vector<16x256xbf16>
      %c128 = arith.constant 128 : index
      %c0_56 = arith.constant 0 : index
      %156 = vector.load %arg8[%c128, %c0_56] : memref<144x256xbf16, #tpu.memory_space<vmem>>, vector<16x256xbf16>
      tpu.vector_store %arg8[%c128, %c0_56], %155 {strides = array<i32>} : memref<144x256xbf16, #tpu.memory_space<vmem>>, vector<16x256xbf16>,
      %c0_57 = arith.constant 0 : index
      %c0_58 = arith.constant 0 : index
      %157 = vector.load %arg3[%c0_57, %c0_58] : memref<32x144xbf16, #tpu.memory_space<vmem>>, vector<32x144xbf16>
      %c0_59 = arith.constant 0 : index
      %c0_60 = arith.constant 0 : index
      %158 = vector.load %arg8[%c0_59, %c0_60] : memref<144x256xbf16, #tpu.memory_space<vmem>>, vector<144x256xbf16>
      %cst_61 = arith.constant dense<0.000000e+00> : vector<32x256xf32>
      %159 = tpu.matmul %157, %158, %cst_61 {dimension_numbers = #tpu.dot_dimension_numbers<[1], [0], [0], [1], [0, 0, 1, 1], [], []>} : vector<32x144xbf16>, vector<144x256xbf16>, vector<32x256xf32> -> vector<32x256xf32>
      %c0_62 = arith.constant 0 : index
      %c0_63 = arith.constant 0 : index
      %160 = vector.load %arg5[%c0_62, %c0_63] : memref<64x1xf32, #tpu.memory_space<vmem>>, vector<32x1xf32>
      %c0_64 = arith.constant 0 : index
      %c0_65 = arith.constant 0 : index
      %161 = vector.load %arg6[%c0_64, %c0_65] : memref<64x1xf32, #tpu.memory_space<vmem>>, vector<32x1xf32>
      %cst_66 = arith.constant dense<0.000000e+00> : vector<32xf32>
      %162 = vector.multi_reduction <add>, %159, %cst_66 [1] : vector<32x256xf32> to vector<32xf32>
      %163 = vector.shape_cast %162 : vector<32xf32> to vector<32x1xf32>
      %164 = arith.mulf %159, %159 : vector<32x256xf32>
      %cst_67 = arith.constant dense<0.000000e+00> : vector<32xf32>
      %165 = vector.multi_reduction <add>, %164, %cst_67 [1] : vector<32x256xf32> to vector<32xf32>
      %166 = vector.shape_cast %165 : vector<32xf32> to vector<32x1xf32>
      %cst_68 = arith.constant 3.906250e-03 : f32
      %167 = vector.broadcast %cst_68 : f32 to vector<32x1xf32>
      %168 = arith.mulf %163, %167 : vector<32x1xf32>
      %cst_69 = arith.constant 3.906250e-03 : f32
      %169 = vector.broadcast %cst_69 : f32 to vector<32x1xf32>
      %170 = arith.mulf %166, %169 : vector<32x1xf32>
      %171 = arith.mulf %168, %168 : vector<32x1xf32>
      %172 = arith.subf %170, %171 : vector<32x1xf32>
      %cst_70 = arith.constant 9.99999974E-6 : f32
      %173 = vector.broadcast %cst_70 : f32 to vector<32x1xf32>
      %174 = arith.addf %172, %173 : vector<32x1xf32>
      %175 = math.rsqrt %174 : vector<32x1xf32>
      %176 = arith.mulf %160, %175 : vector<32x1xf32>
      %177 = vector.broadcast %176 : vector<32x1xf32> to vector<32x256xf32>
      %178 = arith.mulf %159, %177 : vector<32x256xf32>
      %179 = arith.mulf %168, %176 : vector<32x1xf32>
      %180 = arith.subf %161, %179 : vector<32x1xf32>
      %181 = vector.broadcast %180 : vector<32x1xf32> to vector<32x256xf32>
      %182 = arith.addf %178, %181 : vector<32x256xf32>
      %cst_71 = arith.constant 0.000000e+00 : f32
      %183 = vector.broadcast %cst_71 : f32 to vector<32x256xf32>
      %184 = arith.maximumf %182, %183 : vector<32x256xf32>
      %c0_72 = arith.constant 0 : index
      %c0_73 = arith.constant 0 : index
      %185 = vector.load %arg7[%c0_72, %c0_73] : memref<32x256xf32, #tpu.memory_space<vmem>>, vector<32x256xf32>
      tpu.vector_store %arg7[%c0_72, %c0_73], %184 {strides = array<i32>} : memref<32x256xf32, #tpu.memory_space<vmem>>, vector<32x256xf32>,
    } else {
    }
    %c1_i32_8 = arith.constant 1 : i32
    %24 = arith.cmpi eq, %arg0, %c1_i32_8 : i32
    %25 = arith.extui %24 : i1 to i32
    %c0_i32_9 = arith.constant 0 : i32
    %26 = arith.cmpi ne, %25, %c0_i32_9 : i32
    scf.if %26 {
      %c1_i32_10 = arith.constant 1 : i32
      %27 = tpu.dynamic_rotate %20 by %c1_i32_10 dim 1 : vector<16x256xf32>, i32 -> vector<16x256xf32>
      %c-1_i32 = arith.constant -1 : i32
      %28 = vector.broadcast %c-1_i32 : i32 to vector<1x256xi32>
      %29 = arith.addi %16, %28 : vector<1x256xi32>
      %c0_i32_11 = arith.constant 0 : i32
      %30 = vector.broadcast %c0_i32_11 : i32 to vector<1x256xi32>
      %31 = arith.cmpi sge, %29, %30 : vector<1x256xi32>
      %c-1_i32_12 = arith.constant -1 : i32
      %32 = vector.broadcast %c-1_i32_12 : i32 to vector<1x256xi32>
      %33 = arith.addi %16, %32 : vector<1x256xi32>
      %c128_i32_13 = arith.constant 128 : i32
      %34 = vector.broadcast %c128_i32_13 : i32 to vector<1x256xi32>
      %35 = arith.cmpi slt, %33, %34 : vector<1x256xi32>
      %36 = arith.andi %31, %35 : vector<1x256xi1>
      %cst_14 = arith.constant 0.000000e+00 : f32
      %37 = vector.broadcast %cst_14 : f32 to vector<16x256xf32>
      %38 = vector.shape_cast %36 : vector<1x256xi1> to vector<1x256xi1>
      %39 = vector.broadcast %38 : vector<1x256xi1> to vector<16x256xi1>
      %40 = arith.select %39, %27, %37 : vector<16x256xi1>, vector<16x256xf32>
      %41 = arith.truncf %40 : vector<16x256xf32> to vector<16x256xbf16>
      %c0_15 = arith.constant 0 : index
      %c0_16 = arith.constant 0 : index
      %42 = vector.load %arg9[%c0_15, %c0_16] : memref<64x256xbf16, #tpu.memory_space<vmem>>, vector<16x256xbf16>
      tpu.vector_store %arg9[%c0_15, %c0_16], %41 {strides = array<i32>} : memref<64x256xbf16, #tpu.memory_space<vmem>>, vector<16x256xbf16>,
      %43 = arith.truncf %20 : vector<16x256xf32> to vector<16x256xbf16>
      %c16 = arith.constant 16 : index
      %c0_17 = arith.constant 0 : index
      %44 = vector.load %arg9[%c16, %c0_17] : memref<64x256xbf16, #tpu.memory_space<vmem>>, vector<16x256xbf16>
      tpu.vector_store %arg9[%c16, %c0_17], %43 {strides = array<i32>} : memref<64x256xbf16, #tpu.memory_space<vmem>>, vector<16x256xbf16>,
      %c255_i32 = arith.constant 255 : i32
      %45 = tpu.dynamic_rotate %20 by %c255_i32 dim 1 : vector<16x256xf32>, i32 -> vector<16x256xf32>
      %c1_i32_18 = arith.constant 1 : i32
      %46 = vector.broadcast %c1_i32_18 : i32 to vector<1x256xi32>
      %47 = arith.addi %16, %46 : vector<1x256xi32>
      %c0_i32_19 = arith.constant 0 : i32
      %48 = vector.broadcast %c0_i32_19 : i32 to vector<1x256xi32>
      %49 = arith.cmpi sge, %47, %48 : vector<1x256xi32>
      %c1_i32_20 = arith.constant 1 : i32
      %50 = vector.broadcast %c1_i32_20 : i32 to vector<1x256xi32>
      %51 = arith.addi %16, %50 : vector<1x256xi32>
      %c128_i32_21 = arith.constant 128 : i32
      %52 = vector.broadcast %c128_i32_21 : i32 to vector<1x256xi32>
      %53 = arith.cmpi slt, %51, %52 : vector<1x256xi32>
      %54 = arith.andi %49, %53 : vector<1x256xi1>
      %cst_22 = arith.constant 0.000000e+00 : f32
      %55 = vector.broadcast %cst_22 : f32 to vector<16x256xf32>
      %56 = vector.shape_cast %54 : vector<1x256xi1> to vector<1x256xi1>
      %57 = vector.broadcast %56 : vector<1x256xi1> to vector<16x256xi1>
      %58 = arith.select %57, %45, %55 : vector<16x256xi1>, vector<16x256xf32>
      %59 = arith.truncf %58 : vector<16x256xf32> to vector<16x256xbf16>
      %c32 = arith.constant 32 : index
      %c0_23 = arith.constant 0 : index
      %60 = vector.load %arg9[%c32, %c0_23] : memref<64x256xbf16, #tpu.memory_space<vmem>>, vector<16x256xbf16>
      tpu.vector_store %arg9[%c32, %c0_23], %59 {strides = array<i32>} : memref<64x256xbf16, #tpu.memory_space<vmem>>, vector<16x256xbf16>,
      %c1_i32_24 = arith.constant 1 : i32
      %61 = vector.broadcast %c1_i32_24 : i32 to vector<1x256xi32>
      %62 = arith.cmpi sge, %16, %61 : vector<1x256xi32>
      %c1_i32_25 = arith.constant 1 : i32
      %63 = tpu.dynamic_rotate %17 by %c1_i32_25 dim 1 : vector<16x256xf32>, i32 -> vector<16x256xf32>
      %64 = vector.shape_cast %62 : vector<1x256xi1> to vector<1x256xi1>
      %65 = vector.broadcast %64 : vector<1x256xi1> to vector<16x256xi1>
      %66 = arith.select %65, %63, %17 : vector<16x256xi1>, vector<16x256xf32>
      %c126_i32 = arith.constant 126 : i32
      %67 = vector.broadcast %c126_i32 : i32 to vector<1x256xi32>
      %68 = arith.cmpi sle, %16, %67 : vector<1x256xi32>
      %c255_i32_26 = arith.constant 255 : i32
      %69 = tpu.dynamic_rotate %17 by %c255_i32_26 dim 1 : vector<16x256xf32>, i32 -> vector<16x256xf32>
      %70 = vector.shape_cast %68 : vector<1x256xi1> to vector<1x256xi1>
      %71 = vector.broadcast %70 : vector<1x256xi1> to vector<16x256xi1>
      %72 = arith.select %71, %69, %17 : vector<16x256xi1>, vector<16x256xf32>
      %73 = arith.maximumf %66, %72 : vector<16x256xf32>
      %74 = arith.maximumf %17, %73 : vector<16x256xf32>
      %75 = arith.truncf %74 : vector<16x256xf32> to vector<16x256xbf16>
      %c48 = arith.constant 48 : index
      %c0_27 = arith.constant 0 : index
      %76 = vector.load %arg9[%c48, %c0_27] : memref<64x256xbf16, #tpu.memory_space<vmem>>, vector<16x256xbf16>
      tpu.vector_store %arg9[%c48, %c0_27], %75 {strides = array<i32>} : memref<64x256xbf16, #tpu.memory_space<vmem>>, vector<16x256xbf16>,
      %c0_28 = arith.constant 0 : index
      %c0_29 = arith.constant 0 : index
      %77 = vector.load %arg4[%c0_28, %c0_29] : memref<32x64xbf16, #tpu.memory_space<vmem>>, vector<32x64xbf16>
      %c0_30 = arith.constant 0 : index
      %c0_31 = arith.constant 0 : index
      %78 = vector.load %arg9[%c0_30, %c0_31] : memref<64x256xbf16, #tpu.memory_space<vmem>>, vector<64x256xbf16>
      %cst_32 = arith.constant dense<0.000000e+00> : vector<32x256xf32>
      %79 = tpu.matmul %77, %78, %cst_32 {dimension_numbers = #tpu.dot_dimension_numbers<[1], [0], [0], [1], [0, 0, 1, 1], [], []>} : vector<32x64xbf16>, vector<64x256xbf16>, vector<32x256xf32> -> vector<32x256xf32>
      %c32_33 = arith.constant 32 : index
      %c0_34 = arith.constant 0 : index
      %80 = vector.load %arg5[%c32_33, %c0_34] : memref<64x1xf32, #tpu.memory_space<vmem>>, vector<32x1xf32>
      %c32_35 = arith.constant 32 : index
      %c0_36 = arith.constant 0 : index
      %81 = vector.load %arg6[%c32_35, %c0_36] : memref<64x1xf32, #tpu.memory_space<vmem>>, vector<32x1xf32>
      %cst_37 = arith.constant dense<0.000000e+00> : vector<32xf32>
      %82 = vector.multi_reduction <add>, %79, %cst_37 [1] : vector<32x256xf32> to vector<32xf32>
      %83 = vector.shape_cast %82 : vector<32xf32> to vector<32x1xf32>
      %84 = arith.mulf %79, %79 : vector<32x256xf32>
      %cst_38 = arith.constant dense<0.000000e+00> : vector<32xf32>
      %85 = vector.multi_reduction <add>, %84, %cst_38 [1] : vector<32x256xf32> to vector<32xf32>
      %86 = vector.shape_cast %85 : vector<32xf32> to vector<32x1xf32>
      %cst_39 = arith.constant 3.906250e-03 : f32
      %87 = vector.broadcast %cst_39 : f32 to vector<32x1xf32>
      %88 = arith.mulf %83, %87 : vector<32x1xf32>
      %cst_40 = arith.constant 3.906250e-03 : f32
      %89 = vector.broadcast %cst_40 : f32 to vector<32x1xf32>
      %90 = arith.mulf %86, %89 : vector<32x1xf32>
      %91 = arith.mulf %88, %88 : vector<32x1xf32>
      %92 = arith.subf %90, %91 : vector<32x1xf32>
      %cst_41 = arith.constant 9.99999974E-6 : f32
      %93 = vector.broadcast %cst_41 : f32 to vector<32x1xf32>
      %94 = arith.addf %92, %93 : vector<32x1xf32>
      %95 = math.rsqrt %94 : vector<32x1xf32>
      %96 = arith.mulf %80, %95 : vector<32x1xf32>
      %97 = vector.broadcast %96 : vector<32x1xf32> to vector<32x256xf32>
      %98 = arith.mulf %79, %97 : vector<32x256xf32>
      %99 = arith.mulf %88, %96 : vector<32x1xf32>
      %100 = arith.subf %81, %99 : vector<32x1xf32>
      %101 = vector.broadcast %100 : vector<32x1xf32> to vector<32x256xf32>
      %102 = arith.addf %98, %101 : vector<32x256xf32>
      %cst_42 = arith.constant 0.000000e+00 : f32
      %103 = vector.broadcast %cst_42 : f32 to vector<32x256xf32>
      %104 = arith.maximumf %102, %103 : vector<32x256xf32>
      %c0_43 = arith.constant 0 : index
      %c0_44 = arith.constant 0 : index
      %105 = vector.load %arg7[%c0_43, %c0_44] : memref<32x256xf32, #tpu.memory_space<vmem>>, vector<32x256xf32>
      tpu.vector_store %arg7[%c0_43, %c0_44], %104 {strides = array<i32>} : memref<32x256xf32, #tpu.memory_space<vmem>>, vector<32x256xf32>,
    } else {
    }
    return
  }
  func.func @transform_0(%arg0: i32) -> (i32, i32) {
    %c0_i32 = arith.constant 0 : i32
    %c0_i32_0 = arith.constant 0 : i32
    %c0_i32_1 = arith.constant 0 : i32
    return %c0_i32, %c0_i32_0 : i32, i32
  }
  func.func @transform_1(%arg0: i32) -> (i32, i32) {
    %c0_i32 = arith.constant 0 : i32
    %c0_i32_0 = arith.constant 0 : i32
    %c0_i32_1 = arith.constant 0 : i32
    return %c0_i32, %c0_i32_0 : i32, i32
  }
  func.func @transform_2(%arg0: i32) -> (i32, i32) {
    %c0_i32 = arith.constant 0 : i32
    %c0_i32_0 = arith.constant 0 : i32
    %c0_i32_1 = arith.constant 0 : i32
    return %c0_i32, %c0_i32_0 : i32, i32
  }
  func.func @transform_3(%arg0: i32) -> (i32, i32) {
    %c0_i32 = arith.constant 0 : i32
    %c0_i32_0 = arith.constant 0 : i32
    %c0_i32_1 = arith.constant 0 : i32
    return %c0_i32, %c0_i32_0 : i32, i32
  }
  func.func @transform_4(%arg0: i32) -> (i32, i32) {
    %c0_i32 = arith.constant 0 : i32
    %c0_i32_0 = arith.constant 0 : i32
    %c0_i32_1 = arith.constant 0 : i32
    return %c0_i32, %c0_i32_0 : i32, i32
  }
  func.func @transform_5(%arg0: i32) -> (i32, i32) {
    %c0_i32 = arith.constant 0 : i32
    %c0_i32_0 = arith.constant 0 : i32
    %c0_i32_1 = arith.constant 0 : i32
    return %c0_i32, %c0_i32_0 : i32, i32
  }
  func.func @transform_6(%arg0: i32) -> (i32, i32) {
    %c0_i32 = arith.constant 0 : i32
    %c0_i32_0 = arith.constant 0 : i32
    return %arg0, %c0_i32 : i32, i32
  }
}

</mosaic_0001>

<bundles_post_ra>
// kernel: inception_forward.1
= control target key start
LH: loop header
LB: loop body
LE: loop exit
PB: predicated region body
PF: predicated region fallthrough
CT: control target
= control target key end

     0   :  { %s1948_s21 = smov 0   ;;  %s2404_s0 = inlined_call_operand.vmem [shape: f32[16,256], index: 0, kind: input, shape index: {}]   ;;  %s2405_s1 = inlined_call_operand.vmem [shape: bf16[16,16], index: 1, kind: input, shape index: {}]   ;;  %s2406_s2 = inlined_call_operand.vmem [shape: bf16[32,144], index: 2, kind: input, shape index: {}]   ;;  %s2407_s3 = inlined_call_operand.vmem [shape: bf16[32,64], index: 3, kind: input, shape index: {}]   ;;  %s2408_s4 = inlined_call_operand.vmem [shape: f32[64,1], index: 4, kind: input, shape index: {}]   ;;  %s2409_s5 = inlined_call_operand.vmem [shape: f32[64,1], index: 5, kind: input, shape index: {}]   ;;  %s2410_s6 = inlined_call_operand.vmem [shape: f32[64,256], index: 6, kind: output, shape index: {}]  }
   0x1 LB: > { %s1954_s22 = sadd.s32 4294967295, %s1898_s21   ;;  %p1511_p0 = scmp.ge.s32.totalorder %s1898_s21, 1  ;;  %s1898_s21 = sphi %s1948_s21, %s16_s21  }
   0x2   : > { %p202_p1 = scmp.lt.s32.totalorder %s1898_s21, 3 }
   0x4   : > { %p203_p2 = pnand %p1511_p0, %p202_p1 }
   0x5   : > { %s1512_s23 = sshll.u32 (!%p203_p2), %s1954_s22, 2  ;;  %p1517_p4 = scmp.ne.s32.totalorder (!%p203_p2), %s1954_s22, 0 }
   0x6   : > { %206 = sbr.rel (%p203_p2) target bundleno = 1576 (0x628), region = 44  ;;  %p229_p3 = scmp.lt.s32.totalorder (!%p203_p2), %s1512_s23, 7 }
   0xb   : > { %v236_v0 = vlaneseq  ;;  %v1962_v1 = vld [vmem:[%s2404_s0 + $0x8] sm:$0xff]  ;;  %v1967_v2 = vld [vmem:[%s2404_s0 + $0x18] sm:$0xff]  ;;  %v1972_v3 = vld [vmem:[%s2404_s0] sm:$0xff]  ;;  %v1900_v6 = vmov 0   ;;  %s2416_s23 = smov (!%p229_p3, %s1512_s23), 7  ;;  %vm276_vm0 = vcmask 130048  }
   0xc   : > { %v270_v4 = vpack.c.bf16 %v1967_v2, %v1962_v1  ;;  %v1979_v5 = vld [vmem:[%s2404_s0 + $0x10] sm:$0xff]  ;;  %312 = vmatprep.mubr.bf16.mxu0 %v1900_v6  ;;  %v1743_v9 = vld [vmem:[%s2405_s1] sm:$0xff]   ;;  %s1583_s10 = sshll.u32 %s2416_s23, 4  ;;  %s1901_s14 = smov (!%p1517_p4), 125  }
   0xd   : > { %v1981_v7 = vand.u32 127, %v236_v0  ;;  %v269_v8 = vpack.c.bf16 %v1979_v5, %v1972_v3  ;;  %s1992_s13 = scalar_lea.vmem %s2410_s6, %s1583_s10  ;;  %s1902_s15 = smov (!%p1517_p4), 126  }
   0xe   : > { %294 = vmatprep.subr.bf16.mxu0 %v270_v4  ;;  %s1903_s16 = smov (!%p1517_p4), 127   ;;  %s1904_s17 = smov (!%p1517_p4), 1  }
   0xf   : > { %v238_v10 = vadd.s32 128, %v1981_v7  ;;  %295 = vmatpush1.bf16.msra.mxu0 %v269_v8  ;;  %s1905_s18 = smov (!%p1517_p4), 2   ;;  %s1906_s19 = smov (!%p1517_p4), 3  }
  0x10   : > { %s1907_s20 = smov (!%p1517_p4), 4   ;;  %s1908_s23 = smov (!%p1517_p4), 124  }
  0x11   : > { %v1994_v11 = vand.u32 127, %v238_v10 }
  0x12   : > { %1516 = vmatmul.mubr.msk.bf16.vlgmr.msra.gmra.mxu0 %vm276_vm0, %v1743_v9 }
  0xd2   : > { %v1997_v12 = vpop.f32.mrf.mxu0 }
  0xd4   : > { %v1999_v13 = vpop.f32.mrf.mxu0  ;;  %326 = sbr.rel (%p1517_p4) target bundleno = 899 (0x383), region = 48 }
  0xd6   : > { %v2001_v14 = vpop.f32.mrf.mxu0 }
  0xd8   : > { %v2003_v15 = vpop.f32.mrf.mxu0 }
  0xd9   : > { %v1744_v16 = vpack.i.bf16 %v2001_v14, %v1997_v12  ;;  %v1749_v17 = vpack.i.bf16 %v2003_v15, %v1999_v13  ;;  %v1828_v18 = vld [vmem:[%s2406_s2 + $0x4] ss:$8 sps:$4 sm:$0xff]   ;;  %v1831_v19 = vld [vmem:[%s2406_s2 + $0x14] ss:$8 sps:$4 sm:$0xff]   ;;  %v613_v22 = vadd.s32 3, %v1994_v11  ;;  %vm564_vm1 = vcmp.lt.s32.totalorder %v1981_v7, 126 }
  0xda   : > { %1558 = vmatprep.mubr.msk.bf16.mxu0 %vm276_vm0, %v1828_v18  ;;  %1559 = vmatprep.mubr.msk.bf16.mxu1 %vm276_vm0, %v1831_v19  ;;  %v612_v23 = vadd.s32 3, %v1981_v7  ;;  %v570_v26 = vadd.s32 2, %v1994_v11  ;;  %v569_v27 = vadd.s32 2, %v1981_v7  ;;  %vm607_vm2 = vcmp.lt.s32.totalorder %v1981_v7, 125 }
  0xdb   : > { %1745 = vrot.lane.b32.xlu0 %v1744_v16, %s1901_s14  ;;  %1755 = vrot.lane.b32.xlu1 %v1744_v16, %s1902_s15  ;;  %vm617_vm3 = vcmp.lt.s32.totalorder %v613_v22, 128  ;;  %vm521_vm4 = vcmp.lt.s32.totalorder %v1981_v7, 127  ;;  %v527_v30 = vadd.s32 1, %v1994_v11  ;;  %v526_v37 = vadd.s32 1, %v1981_v7 }
  0xdc   : > { %vm616_vm5 = vcmp.lt.s32.totalorder %v612_v23, 128  ;;  %vm574_vm6 = vcmp.lt.s32.totalorder %v570_v26, 128  ;;  %vm573_vm7 = vcmp.lt.s32.totalorder %v569_v27, 128  ;;  %vm1628_vm8 = vmpackc.low %vm617_vm3, %vm617_vm3  ;;  %vm464_vm15 = vcmp.lt.s32.totalorder %v1981_v7, 1 }
  0xdd   : > { %vm1631_vm9 = vmpackc.low %vm616_vm5, %vm616_vm5  ;;  %vm531_vm11 = vcmp.lt.s32.totalorder %v527_v30, 128  ;;  %vm530_vm12 = vcmp.lt.s32.totalorder %v526_v37, 128  ;;  %v470_v9 = vadd.s32 4294967295, %v1994_v11  ;;  %v427_v26 = vadd.s32 4294967294, %v1994_v11 }
  0xde   : > { %vm2047_vm10 = vmpackc.low %vm574_vm6, %vm574_vm6  ;;  %v426_v27 = vadd.s32 4294967294, %v1981_v7  ;;  %v1618_v30 = vpack.c.bf16 %v2001_v14, %v1997_v12  ;;  %vm378_vm5 = vcmp.lt.s32.totalorder %v1981_v7, 3 }
  0xdf   : > { %1750 = vrot.lane.b32.xlu0 %v1749_v17, %s1901_s14  ;;  %1760 = vrot.lane.b32.xlu1 %v1749_v17, %s1902_s15  ;;  %vm1637_vm13 = vmpackc.low %vm573_vm7, %vm573_vm7  ;;  %vm429_vm6 = vcmp.ge.s32.totalorder %v427_v26, 0 }
  0xe0   : > { %vm1640_vm14 = vmpackc.low %vm531_vm11, %vm531_vm11  ;;  %vm428_vm7 = vcmp.ge.s32.totalorder %v426_v27, 0 }
  0xe1   : > { %vm1643_vm0 = vmpackc.low %vm530_vm12, %vm530_vm12 }
  0xe3   : > { %1770 = vrot.lane.b32.xlu1 %v1749_v17, %s1903_s16  ;;  %1765 = vrot.lane.b32.xlu0 %v1744_v16, %s1903_s16 }
  0xe7   : > { %1780 = vrot.lane.b32.xlu1 %v1749_v17, %s1904_s17  ;;  %1775 = vrot.lane.b32.xlu0 %v1744_v16, %s1904_s17 }
  0xeb   : > { %1790 = vrot.lane.b32.xlu1 %v1749_v17, %s1905_s18  ;;  %1785 = vrot.lane.b32.xlu0 %v1744_v16, %s1905_s18 }
  0xef   : > { %1800 = vrot.lane.b32.xlu1 %v1749_v17, %s1906_s19  ;;  %1795 = vrot.lane.b32.xlu0 %v1744_v16, %s1906_s19 }
  0xf3   : > { %1810 = vrot.lane.b32.xlu1 %v1749_v17, %s1907_s20  ;;  %1805 = vrot.lane.b32.xlu0 %v1744_v16, %s1907_s20 }
  0xf7   : > { %1820 = vrot.lane.b32.xlu1 %v1749_v17, %s1908_s23  ;;  %1815 = vrot.lane.b32.xlu0 %v1744_v16, %s1908_s23  ;;  %v1619_v16 = vpack.c.bf16 %v2003_v15, %v1999_v13 }
 0x14d   : > { %v1746_v20 = vpop.permute.xlu0 %1745  ;;  %v1756_v21 = vpop.permute.xlu1 %1755 }
 0x14e   : > { %v1758_v24 = vunpack.i.h.bf16 %v1756_v21  ;;  %v1757_v25 = vunpack.i.l.bf16 %v1756_v21  ;;  %v1748_v35 = vunpack.i.h.bf16 %v1746_v20  ;;  %v1747_v36 = vunpack.i.l.bf16 %v1746_v20 }
 0x14f   : > { %v469_v21 = vadd.s32 4294967295, %v1981_v7 }
 0x151   : > { %v1751_v28 = vpop.permute.xlu0 %1750  ;;  %v1761_v29 = vpop.permute.xlu1 %1760  ;;  %vm471_vm3 = vcmp.ge.s32.totalorder %v469_v21, 0 }
 0x152   : > { %v1753_v31 = vunpack.i.h.bf16 %v1751_v28  ;;  %v1752_v32 = vunpack.i.l.bf16 %v1751_v28  ;;  %v1763_v33 = vunpack.i.h.bf16 %v1761_v29  ;;  %v1762_v34 = vunpack.i.l.bf16 %v1761_v29 }
 0x154   : > { %v565_v38 = vsel %vm564_vm1, %v1757_v25, %v1762_v34  ;;  %v566_v39 = vsel %vm564_vm1, %v1758_v24, %v1763_v33  ;;  %v567_v40 = vsel %vm564_vm1, %v1762_v34, %v1757_v25  ;;  %v568_v41 = vsel %vm564_vm1, %v1763_v33, %v1758_v24 }
 0x155   : > { %v610_v42 = vsel %vm607_vm2, %v1752_v32, %v1747_v36  ;;  %v611_v43 = vsel %vm607_vm2, %v1753_v31, %v1748_v35  ;;  %v1771_v44 = vpop.permute.xlu1 %1770  ;;  %v1766_v45 = vpop.permute.xlu0 %1765  ;;  %v608_v47 = vsel %vm607_vm2, %v1747_v36, %v1752_v32  ;;  %v609_v48 = vsel %vm607_vm2, %v1748_v35, %v1753_v31 }
 0x156   : > { %v1629_v46 = vpack.c.bf16 %v611_v43, %v610_v42  ;;  %v1773_v49 = vunpack.i.h.bf16 %v1771_v44  ;;  %v1632_v50 = vpack.c.bf16 %v609_v48, %v608_v47  ;;  %v1772_v52 = vunpack.i.l.bf16 %v1771_v44 }
 0x157   : > { %v1768_v53 = vunpack.i.h.bf16 %v1766_v45  ;;  %v1767_v54 = vunpack.i.l.bf16 %v1766_v45  ;;  %v1635_v55 = vpack.c.bf16 %v568_v41, %v567_v40  ;;  %v1638_v56 = vpack.c.bf16 %v566_v39, %v565_v38 }
 0x158   : > { %1630 = vmatprep.subr.msk.bf16.mxu0 %vm1628_vm8, %v1629_v46  ;;  %1696 = vmatprep.subr.msk.bf16.mxu1 %vm1628_vm8, %v1629_v46  ;;  %vm421_vm1 = vcmp.lt.s32.totalorder %v1981_v7, 2  ;;  %vm472_vm2 = vcmp.ge.s32.totalorder %v470_v9, 0  ;;  %v384_v41 = vadd.s32 4294967293, %v1994_v11  ;;  %vm335_vm8 = vcmp.lt.s32.totalorder %v1981_v7, 4 }
 0x159   : > { %1633 = vmatpush1.bf16.msk.msra.mxu0 %vm1631_vm9, %v1632_v50  ;;  %1705 = vmatpush1.bf16.msk.msra.mxu1 %vm1631_vm9, %v1632_v50  ;;  %v525_v57 = vsel %vm521_vm4, %v1773_v49, %v1768_v53  ;;  %v1781_v58 = vpop.permute.xlu1 %1780  ;;  %v1776_v59 = vpop.permute.xlu0 %1775  ;;  %v523_v60 = vsel %vm521_vm4, %v1768_v53, %v1773_v49  ;;  %v522_v61 = vsel %vm521_vm4, %v1767_v54, %v1772_v52  ;;  %v383_v46 = vadd.s32 4294967293, %v1981_v7  ;;  %vm1649_vm9 = vmpackc.low %vm471_vm3, %vm471_vm3 }
 0x15a   : > { %1636 = vmatprep.subr.msk.bf16.mxu0 %vm2047_vm10, %v1635_v55  ;;  %1697 = vmatprep.subr.msk.bf16.mxu1 %vm2047_vm10, %v1635_v55  ;;  %v524_v62 = vsel %vm521_vm4, %v1772_v52, %v1767_v54  ;;  %v1783_v63 = vunpack.i.h.bf16 %v1781_v58  ;;  %v1782_v4 = vunpack.i.l.bf16 %v1781_v58  ;;  %v1778_v6 = vunpack.i.h.bf16 %v1776_v59  ;;  %vm2093_vm4 = vmpackc.low %vm472_vm2, %vm472_vm2 }
 0x15b   : > { %v1641_v0 = vpack.c.bf16 %v525_v57, %v524_v62  ;;  %v1777_v8 = vunpack.i.l.bf16 %v1776_v59  ;;  %v1644_v10 = vpack.c.bf16 %v523_v60, %v522_v61  ;;  %vm1652_vm10 = vmpackc.low %vm429_vm6, %vm429_vm6  ;;  %vm386_vm11 = vcmp.ge.s32.totalorder %v384_v41, 0 }
 0x15c   : > { %v466_v22 = vsel %vm464_vm15, %v1778_v6, %v1783_v63  ;;  %v468_v28 = vsel %vm464_vm15, %v1783_v63, %v1778_v6  ;;  %v341_v55 = vadd.s32 4294967292, %v1994_v11  ;;  %vm385_vm12 = vcmp.ge.s32.totalorder %v383_v46, 0 }
 0x15d   : > { %1639 = vmatpush1.bf16.msk.msra.mxu0 %vm1637_vm13, %v1638_v56  ;;  %1706 = vmatpush1.bf16.msk.msra.mxu1 %vm1637_vm13, %v1638_v56  ;;  %v1791_v17 = vpop.permute.xlu1 %1790  ;;  %v1786_v18 = vpop.permute.xlu0 %1785  ;;  %v465_v23 = vsel %vm464_vm15, %v1777_v8, %v1782_v4  ;;  %v467_v29 = vsel %vm464_vm15, %v1782_v4, %v1777_v8  ;;  %vm1655_vm13 = vmpackc.low %vm428_vm7, %vm428_vm7  ;;  %vm650_vm15 = vcmp.lt.s32.totalorder %v1981_v7, 124 }
 0x15e   : > { %1642 = vmatprep.subr.msk.bf16.mxu0 %vm1640_vm14, %v1641_v0  ;;  %1698 = vmatprep.subr.msk.bf16.mxu1 %vm1640_vm14, %v1641_v0  ;;  %v1793_v19 = vunpack.i.h.bf16 %v1791_v17  ;;  %v1792_v20 = vunpack.i.l.bf16 %v1791_v17  ;;  %v1788_v24 = vunpack.i.h.bf16 %v1786_v18  ;;  %v1787_v25 = vunpack.i.l.bf16 %v1786_v18  ;;  %vm1658_vm14 = vmpackc.low %vm386_vm11, %vm386_vm11 }
 0x15f   : > { %v1647_v33 = vpack.c.bf16 %v466_v22, %v465_v23  ;;  %v1650_v42 = vpack.c.bf16 %v468_v28, %v467_v29  ;;  %v340_v0 = vadd.s32 4294967292, %v1981_v7  ;;  %v655_v22 = vadd.s32 4, %v1981_v7  ;;  %v1826_v28 = vld [vmem:[%s2406_s2] ss:$8 sps:$4 sm:$0xff]   ;;  %v1829_v29 = vld [vmem:[%s2406_s2 + $0x10] ss:$8 sps:$4 sm:$0xff]  }
 0x160   : > { %v423_v34 = vsel %vm421_vm1, %v1788_v24, %v1793_v19  ;;  %v422_v35 = vsel %vm421_vm1, %v1787_v25, %v1792_v20  ;;  %v425_v43 = vsel %vm421_vm1, %v1793_v19, %v1788_v24  ;;  %v424_v47 = vsel %vm421_vm1, %v1792_v20, %v1787_v25  ;;  %vm1661_vm1 = vmpackc.low %vm385_vm12, %vm385_vm12 }
 0x161   : > { %1645 = vmatpush1.bf16.msk.msra.mxu0 %vm1643_vm0, %v1644_v10  ;;  %1707 = vmatpush1.bf16.msk.msra.mxu1 %vm1643_vm0, %v1644_v10  ;;  %v1801_v31 = vpop.permute.xlu1 %1800  ;;  %v1796_v32 = vpop.permute.xlu0 %1795  ;;  %v1653_v48 = vpack.c.bf16 %v423_v34, %v422_v35  ;;  %v1656_v56 = vpack.c.bf16 %v425_v43, %v424_v47  ;;  %vm343_vm0 = vcmp.ge.s32.totalorder %v341_v55, 0  ;;  %v656_v10 = vadd.s32 4, %v1994_v11 }
 0x162   : > { %827 = vmatprep.subr.bf16.mxu0 %v1619_v16  ;;  %1699 = vmatprep.subr.bf16.mxu1 %v1619_v16  ;;  %v1803_v37 = vunpack.i.h.bf16 %v1801_v31  ;;  %v1802_v38 = vunpack.i.l.bf16 %v1801_v31  ;;  %v1798_v39 = vunpack.i.h.bf16 %v1796_v32  ;;  %v1797_v40 = vunpack.i.l.bf16 %v1796_v32  ;;  %vm1664_vm2 = vmpackc.low %vm343_vm0, %vm343_vm0 }
 0x163   : > { %vm342_vm3 = vcmp.ge.s32.totalorder %v340_v0, 0  ;;  %vm659_vm7 = vcmp.lt.s32.totalorder %v655_v22, 128 }
 0x164   : > { %v380_v51 = vsel %vm378_vm5, %v1798_v39, %v1803_v37  ;;  %v379_v52 = vsel %vm378_vm5, %v1797_v40, %v1802_v38  ;;  %v382_v57 = vsel %vm378_vm5, %v1803_v37, %v1798_v39  ;;  %v381_v58 = vsel %vm378_vm5, %v1802_v38, %v1797_v40  ;;  %vm1667_vm5 = vmpackc.low %vm342_vm3, %vm342_vm3 }
 0x165   : > { %828 = vmatpush1.bf16.msra.mxu0 %v1618_v30  ;;  %1708 = vmatpush1.bf16.msra.mxu1 %v1618_v30  ;;  %v1811_v44 = vpop.permute.xlu1 %1810  ;;  %v1806_v45 = vpop.permute.xlu0 %1805  ;;  %v1659_v61 = vpack.c.bf16 %v380_v51, %v379_v52  ;;  %v1662_v16 = vpack.c.bf16 %v382_v57, %v381_v58 }
 0x166   : > { %1648 = vmatprep.subr.msk.bf16.mxu0 %vm2093_vm4, %v1647_v33  ;;  %1700 = vmatprep.subr.msk.bf16.mxu1 %vm2093_vm4, %v1647_v33  ;;  %v1813_v49 = vunpack.i.h.bf16 %v1811_v44  ;;  %v1812_v50 = vunpack.i.l.bf16 %v1811_v44  ;;  %v1808_v53 = vunpack.i.h.bf16 %v1806_v45  ;;  %v1807_v54 = vunpack.i.l.bf16 %v1806_v45 }
 0x167   : > { %vm660_vm4 = vcmp.lt.s32.totalorder %v656_v10, 128 }
 0x168   : > { %v337_v62 = vsel %vm335_vm8, %v1808_v53, %v1813_v49  ;;  %v336_v63 = vsel %vm335_vm8, %v1807_v54, %v1812_v50  ;;  %v339_v17 = vsel %vm335_vm8, %v1813_v49, %v1808_v53  ;;  %v338_v18 = vsel %vm335_vm8, %v1812_v50, %v1807_v54  ;;  %vm1670_vm6 = vmpackc.low %vm660_vm4, %vm660_vm4 }
 0x169   : > { %1651 = vmatpush1.bf16.msk.msra.mxu0 %vm1649_vm9, %v1650_v42  ;;  %1709 = vmatpush1.bf16.msk.msra.mxu1 %vm1649_vm9, %v1650_v42  ;;  %v1821_v59 = vpop.permute.xlu1 %1820  ;;  %v1816_v60 = vpop.permute.xlu0 %1815  ;;  %v1665_v19 = vpack.c.bf16 %v337_v62, %v336_v63  ;;  %v1668_v23 = vpack.c.bf16 %v339_v17, %v338_v18  ;;  %vm1673_vm8 = vmpackc.low %vm659_vm7, %vm659_vm7  ;;  %v1909_v54 = vmov 0  }
 0x16a   : > { %1654 = vmatprep.subr.msk.bf16.mxu0 %vm1652_vm10, %v1653_v48  ;;  %1701 = vmatprep.subr.msk.bf16.mxu1 %vm1652_vm10, %v1653_v48  ;;  %v1823_v4 = vunpack.i.h.bf16 %v1821_v59  ;;  %v1822_v6 = vunpack.i.l.bf16 %v1821_v59  ;;  %v1818_v8 = vunpack.i.h.bf16 %v1816_v60  ;;  %v1817_v9 = vunpack.i.l.bf16 %v1816_v60 }
 0x16b   : > { %1824 = vset.pattern.permute.xlu1 %v1909_v54  ;;  %1825 = vset.pattern.permute.xlu0 %v1909_v54 }
 0x16c   : > { %v654_v20 = vsel %vm650_vm15, %v1823_v4, %v1818_v8  ;;  %v653_v21 = vsel %vm650_vm15, %v1822_v6, %v1817_v9  ;;  %v652_v24 = vsel %vm650_vm15, %v1818_v8, %v1823_v4  ;;  %v651_v25 = vsel %vm650_vm15, %v1817_v9, %v1822_v6 }
 0x16d   : > { %1657 = vmatpush1.bf16.msk.msra.mxu0 %vm1655_vm13, %v1656_v56  ;;  %1710 = vmatpush1.bf16.msk.msra.mxu1 %vm1655_vm13, %v1656_v56  ;;  %v1671_v26 = vpack.c.bf16 %v654_v20, %v653_v21  ;;  %v1674_v27 = vpack.c.bf16 %v652_v24, %v651_v25 }
 0x16e   : > { %1660 = vmatprep.subr.msk.bf16.mxu0 %vm1658_vm14, %v1659_v61  ;;  %1702 = vmatprep.subr.msk.bf16.mxu1 %vm1658_vm14, %v1659_v61 }
 0x171   : > { %1663 = vmatpush1.bf16.msk.msra.mxu0 %vm1661_vm1, %v1662_v16  ;;  %1711 = vmatpush1.bf16.msk.msra.mxu1 %vm1661_vm1, %v1662_v16 }
 0x172   : > { %1666 = vmatprep.subr.msk.bf16.mxu0 %vm1664_vm2, %v1665_v19  ;;  %1703 = vmatprep.subr.msk.bf16.mxu1 %vm1664_vm2, %v1665_v19 }
 0x175   : > { %1669 = vmatpush1.bf16.msk.msra.mxu0 %vm1667_vm5, %v1668_v23  ;;  %1712 = vmatpush1.bf16.msk.msra.mxu1 %vm1667_vm5, %v1668_v23 }
 0x176   : > { %1672 = vmatprep.subr.msk.bf16.mxu0 %vm1670_vm6, %v1671_v26  ;;  %1704 = vmatprep.subr.msk.bf16.mxu1 %vm1670_vm6, %v1671_v26 }
 0x179   : > { %1675 = vmatpush2.bf16.msk.msra.mxu0 %vm1673_vm8, %v1674_v27  ;;  %1713 = vmatpush2.bf16.msk.msra.mxu1 %vm1673_vm8, %v1674_v27 }
 0x17c   : > { %854 = vmatmul.mubr.bf16.vlgmr.msra.gmra.mxu0 %v1826_v28  ;;  %864 = vmatmul.mubr.bf16.vlgmr.msra.gmra.mxu1 %v1829_v29  ;;  %v874_v29 = vld [vmem:[%s2408_s4] sm:$0xff] }
 0x23c   : > { %v2154_v30 = vpop.f32.mrf.mxu0  ;;  %v2156_v31 = vpop.f32.mrf.mxu1 }
 0x23d   : > { %v894_v42 = vmul.f32 %v2154_v30, %v2154_v30  ;;  %v898_v43 = vmul.f32 %v2156_v31, %v2156_v31 }
 0x23e   : > { %v2158_v32 = vpop.f32.mrf.mxu0  ;;  %v2160_v33 = vpop.f32.mrf.mxu1 }
 0x23f   : > { %v882_v34 = vadd.f32 %v2158_v32, %v2154_v30  ;;  %v888_v38 = vadd.f32 %v2160_v33, %v2156_v31  ;;  %v895_v40 = vmul.f32 %v2158_v32, %v2158_v32  ;;  %v899_v47 = vmul.f32 %v2160_v33, %v2160_v33 }
 0x240   : > { %v2164_v35 = vpop.f32.mrf.mxu0  ;;  %v2166_v36 = vpop.f32.mrf.mxu1 }
 0x241   : > { %883 = vadd.xlane.f32.xlu0 %v882_v34  ;;  %v902_v45 = vadd.f32 %v895_v40, %v894_v42  ;;  %v896_v48 = vmul.f32 %v2164_v35, %v2164_v35  ;;  %v908_v51 = vadd.f32 %v899_v47, %v898_v43  ;;  %v900_v52 = vmul.f32 %v2166_v36, %v2166_v36  ;;  %v876_v40 = vld [vmem:[%s2408_s4 + $0x10] sm:$0xff]  ;;  %v878_v47 = vld [vmem:[%s2409_s5] sm:$0xff] }
 0x242   : > { %v2168_v37 = vpop.f32.mrf.mxu0  ;;  %v2176_v41 = vpop.f32.mrf.mxu1 }
 0x243   : > { %v885_v39 = vadd.f32 %v2168_v37, %v2164_v35  ;;  %v897_v44 = vmul.f32 %v2168_v37, %v2168_v37  ;;  %v891_v46 = vadd.f32 %v2176_v41, %v2166_v36  ;;  %v901_v49 = vmul.f32 %v2176_v41, %v2176_v41 }
 0x245   : > { %889 = vadd.xlane.f32.xlu0 %v888_v38  ;;  %886 = vadd.xlane.f32.xlu1 %v885_v39  ;;  %v905_v50 = vadd.f32 %v897_v44, %v896_v48  ;;  %v911_v53 = vadd.f32 %v901_v49, %v900_v52  ;;  %v875_v39 = vld [vmem:[%s2408_s4 + $0x8] sm:$0xff] }
 0x249   : > { %903 = vadd.xlane.f32.xlu0 %v902_v45  ;;  %892 = vadd.xlane.f32.xlu1 %v891_v46 }
 0x24d   : > { %906 = vadd.xlane.f32.xlu0 %v905_v50  ;;  %909 = vadd.xlane.f32.xlu1 %v908_v51  ;;  %v877_v50 = vld [vmem:[%s2408_s4 + $0x18] sm:$0xff] }
 0x251   : > { %912 = vadd.xlane.f32.xlu0 %v911_v53  ;;  %v880_v53 = vld [vmem:[%s2409_s5 + $0x10] sm:$0xff] }
 0x2ca   : > { %v884_v55 = vpop.xlane.xlu0 %883 }
 0x2cb   : > { %v914_v58 = vmul.f32 0.00390625, %v884_v55 }
 0x2cd   : > { %v922_v63 = vmul.f32 %v914_v58, %v914_v58 }
 0x2ce   : > { %v890_v56 = vpop.xlane.xlu0 %889  ;;  %v887_v57 = vpop.xlane.xlu1 %886 }
 0x2cf   : > { %v916_v59 = vmul.f32 0.00390625, %v890_v56  ;;  %v915_v60 = vmul.f32 0.00390625, %v887_v57  ;;  %v879_v56 = vld [vmem:[%s2409_s5 + $0x8] sm:$0xff] }
 0x2d1   : > { %v924_v6 = vmul.f32 %v916_v59, %v916_v59  ;;  %v923_v8 = vmul.f32 %v915_v60, %v915_v60 }
 0x2d2   : > { %v904_v61 = vpop.xlane.xlu0 %903  ;;  %v893_v62 = vpop.xlane.xlu1 %892 }
 0x2d3   : > { %v918_v0 = vmul.f32 0.00390625, %v904_v61  ;;  %v917_v17 = vmul.f32 0.00390625, %v893_v62 }
 0x2d5   : > { %v926_v4 = vsub.f32 %v918_v0, %v922_v63  ;;  %v925_v23 = vmul.f32 %v917_v17, %v917_v17 }
 0x2d6   : > { %v907_v9 = vpop.xlane.xlu0 %906  ;;  %v910_v10 = vpop.xlane.xlu1 %909 }
 0x2d7   : > { %v930_v16 = vadd.f32 1e-05, %v926_v4  ;;  %v919_v18 = vmul.f32 0.00390625, %v907_v9  ;;  %v920_v19 = vmul.f32 0.00390625, %v910_v10 }
 0x2d9   : > { %1832 = vrsqrt.f32 %v930_v16  ;;  %v927_v20 = vsub.f32 %v919_v18, %v923_v8  ;;  %v928_v21 = vsub.f32 %v920_v19, %v924_v6 }
 0x2da   : > { %v913_v22 = vpop.xlane.xlu0 %912 }
 0x2db   : > { %v931_v24 = vadd.f32 1e-05, %v927_v20  ;;  %v932_v25 = vadd.f32 1e-05, %v928_v21  ;;  %v921_v26 = vmul.f32 0.00390625, %v913_v22 }
 0x2dd   : > { %1834 = vrsqrt.f32 %v931_v24  ;;  %v929_v27 = vsub.f32 %v921_v26, %v925_v23 }
 0x2de   : > { %1836 = vrsqrt.f32 %v932_v25 }
 0x2df   : > { %v933_v28 = vadd.f32 1e-05, %v929_v27 }
 0x2e1   : > { %1838 = vrsqrt.f32 %v933_v28 }
 0x2e6   : > { %v1833_v34 = vpop.eup %1832 }
 0x2e7   : > { %v938_v38 = vmul.f32 %v1833_v34, %v874_v29 }
 0x2e9   : > { %944 = vperm.xlu1 %1824, %v938_v38   ;;  %v970_v46 = vmul.f32 %v938_v38, %v914_v58 }
 0x2ea   : > { %v1835_v42 = vpop.eup %1834 }
 0x2eb   : > { %v1837_v43 = vpop.eup %1836  ;;  %v939_v44 = vmul.f32 %v1835_v42, %v875_v39  ;;  %v974_v48 = vsub.f32 %v878_v47, %v970_v46 }
 0x2ec   : > { %v940_v45 = vmul.f32 %v1837_v43, %v876_v40 }
 0x2ed   : > { %949 = vperm.xlu0 %1825, %v939_v44   ;;  %v971_v55 = vmul.f32 %v939_v44, %v915_v60 }
 0x2ee   : > { %954 = vperm.xlu1 %1824, %v940_v45   ;;  %v1839_v49 = vpop.eup %1838  ;;  %v972_v52 = vmul.f32 %v940_v45, %v916_v59  ;;  %v881_v59 = vld [vmem:[%s2409_s5 + $0x18] sm:$0xff] }
 0x2ef   : > { %v941_v51 = vmul.f32 %v1839_v49, %v877_v50  ;;  %v975_v57 = vsub.f32 %v879_v56, %v971_v55 }
 0x2f0   : > { %v976_v54 = vsub.f32 %v880_v53, %v972_v52 }
 0x2f1   : > { %v973_v58 = vmul.f32 %v941_v51, %v917_v17 }
 0x2f2   : > { %980 = vperm.xlu1 %1824, %v974_v48  }
 0x2f3   : > { %v977_v61 = vsub.f32 %v881_v59, %v973_v58 }
 0x2f6   : > { %959 = vperm.xlu1 %1824, %v941_v51  }
 0x2fa   : > { %990 = vperm.xlu1 %1824, %v976_v54  }
 0x2fe   : > { %985 = vperm.xlu1 %1824, %v975_v57  }
 0x302   : > { %995 = vperm.xlu1 %1824, %v977_v61  }
 0x364   : > { %v945_v62 = vpop.permute.xlu1 %944 }
 0x365   : > { %v962_v60 = vmul.f32 %v945_v62, %v2154_v30  ;;  %v963_v0 = vmul.f32 %v945_v62, %v2158_v32 }
 0x368   : > { %v950_v17 = vpop.permute.xlu0 %949 }
 0x369   : > { %v955_v63 = vpop.permute.xlu1 %954  ;;  %v964_v30 = vmul.f32 %v950_v17, %v2164_v35  ;;  %v965_v32 = vmul.f32 %v950_v17, %v2168_v37 }
 0x36a   : > { %v966_v19 = vmul.f32 %v955_v63, %v2156_v31  ;;  %v967_v20 = vmul.f32 %v955_v63, %v2160_v33 }
 0x36d   : > { %v981_v4 = vpop.permute.xlu1 %980 }
 0x36e   : > { %v998_v6 = vadd.f32 %v981_v4, %v962_v60  ;;  %v999_v8 = vadd.f32 %v981_v4, %v963_v0 }
 0x370   : > { %v1006_v9 = vmax.f32 %v998_v6, 0.0  ;;  %v1007_v10 = vmax.f32 %v999_v8, 0.0 }
 0x371   : > { %v960_v16 = vpop.permute.xlu1 %959 }
 0x372   : > { %1014 = vst [vmem:[%s1992_s13] sm:$0xff] %v1006_v9  ;;  %1015 = vst [vmem:[%s1992_s13 + $0x8] sm:$0xff] %v1007_v10  ;;  %v968_v26 = vmul.f32 %v960_v16, %v2166_v36  ;;  %v969_v31 = vmul.f32 %v960_v16, %v2176_v41 }
 0x375   : > { %v991_v18 = vpop.permute.xlu1 %990 }
 0x376   : > { %v1002_v21 = vadd.f32 %v991_v18, %v966_v19  ;;  %v1003_v22 = vadd.f32 %v991_v18, %v967_v20 }
 0x378   : > { %v1010_v28 = vmax.f32 %v1002_v21, 0.0  ;;  %v1011_v29 = vmax.f32 %v1003_v22, 0.0 }
 0x379   : > { %v986_v23 = vpop.permute.xlu1 %985 }
 0x37a   : > { %v1000_v24 = vadd.f32 %v986_v23, %v964_v30  ;;  %v1001_v25 = vadd.f32 %v986_v23, %v965_v32  ;;  %1018 = vst [vmem:[%s1992_s13 + $0x20] sm:$0xff] %v1010_v28  ;;  %1019 = vst [vmem:[%s1992_s13 + $0x28] sm:$0xff] %v1011_v29 }
 0x37c   : > { %v1008_v27 = vmax.f32 %v1000_v24, 0.0  ;;  %v1009_v33 = vmax.f32 %v1001_v25, 0.0 }
 0x37d   : > { %v996_v35 = vpop.permute.xlu1 %995 }
 0x37e   : > { %1016 = vst [vmem:[%s1992_s13 + $0x10] sm:$0xff] %v1008_v27  ;;  %1017 = vst [vmem:[%s1992_s13 + $0x18] sm:$0xff] %v1009_v33  ;;  %v1004_v37 = vadd.f32 %v996_v35, %v968_v26  ;;  %v1005_v34 = vadd.f32 %v996_v35, %v969_v31 }
 0x380   : > { %v1012_v38 = vmax.f32 %v1004_v37, 0.0  ;;  %v1013_v39 = vmax.f32 %v1005_v34, 0.0 }
 0x382   : > { %1020 = vst [vmem:[%s1992_s13 + $0x30] sm:$0xff] %v1012_v38  ;;  %1021 = vst [vmem:[%s1992_s13 + $0x38] sm:$0xff] %v1013_v39 }
 0x383 PF: > { %p1560_p5 = scmp.ne.s32.totalorder %s1954_s22, 1 }
 0x384   : > { %s1910_s27 = smov (!%p1560_p5), 127   ;;  %s1911_s28 = smov (!%p1560_p5), 1  }
 0x385   : > { %1025 = sbr.rel (%p1560_p5) target bundleno = 1576 (0x628), region = 52 }
 0x38a   : > { %v1850_v36 = vpack.i.bf16 %v1979_v5, %v1972_v3  ;;  %v1855_v41 = vpack.i.bf16 %v1967_v2, %v1962_v1  ;;  %v1865_v40 = vpack.i.bf16 %v2003_v15, %v1999_v13  ;;  %v1860_v42 = vpack.i.bf16 %v2001_v14, %v1997_v12 }
 0x38b   : > { %v1912_v43 = vmov 0   ;;  %vm1091_vm9 = vcmp.lt.s32.totalorder %v1981_v7, 127  ;;  %vm1034_vm10 = vcmp.lt.s32.totalorder %v1981_v7, 1  ;;  %vm1127_vm11 = vcmp.ge.s32.totalorder %v1994_v11, 1 }
 0x38c   : > { %1851 = vrot.lane.b32.xlu1 %v1850_v36, %s1910_s27  ;;  %1841 = vrot.lane.b32.xlu0 %v1850_v36, %s1911_s28  ;;  %vm1149_vm12 = vcmp.le.s32.totalorder %v1994_v11, 126  ;;  %vm1126_vm13 = vcmp.ge.s32.totalorder %v1981_v7, 1  ;;  %vm1148_vm14 = vcmp.le.s32.totalorder %v1981_v7, 126  ;;  %v1097_v32 = vadd.s32 1, %v1994_v11 }
 0x38d   : > { %1293 = vmatprep.mubr.bf16.mxu0 %v1912_v43  ;;  %1303 = vmatprep.mubr.bf16.mxu1 %v1912_v43  ;;  %v1096_v21 = vadd.s32 1, %v1981_v7  ;;  %vm1254_vm7 = vcmask 523264  }
 0x38e   : > { %1880 = vset.pattern.permute.xlu1 %v1912_v43  ;;  %1881 = vset.pattern.permute.xlu0 %v1912_v43  ;;  %vm1101_vm15 = vcmp.lt.s32.totalorder %v1097_v32, 128 }
 0x38f   : > { %vm1100_vm0 = vcmp.lt.s32.totalorder %v1096_v21, 128  ;;  %vm1684_vm1 = vmpackc.low %vm1101_vm15, %vm1101_vm15 }
 0x390   : > { %1856 = vrot.lane.b32.xlu1 %v1855_v41, %s1910_s27  ;;  %1846 = vrot.lane.b32.xlu0 %v1855_v41, %s1911_s28  ;;  %vm1687_vm2 = vmpackc.low %vm1100_vm0, %vm1100_vm0 }
 0x394   : > { %1866 = vrot.lane.b32.xlu1 %v1865_v40, %s1910_s27  ;;  %1861 = vrot.lane.b32.xlu0 %v1860_v42, %s1910_s27 }
 0x398   : > { %1876 = vrot.lane.b32.xlu1 %v1865_v40, %s1911_s28  ;;  %1871 = vrot.lane.b32.xlu0 %v1860_v42, %s1911_s28 }
 0x3fe   : > { %v1852_v44 = vpop.permute.xlu1 %1851  ;;  %v1842_v45 = vpop.permute.xlu0 %1841 }
 0x3ff   : > { %v1854_v46 = vunpack.i.h.bf16 %v1852_v44  ;;  %v1853_v47 = vunpack.i.l.bf16 %v1852_v44  ;;  %v1844_v48 = vunpack.i.h.bf16 %v1842_v45  ;;  %v1843_v49 = vunpack.i.l.bf16 %v1842_v45 }
 0x400   : > { %v1040_v45 = vadd.s32 4294967295, %v1994_v11  ;;  %v1678_v11 = vpack.c.bf16 %v2001_v14, %v1997_v12  ;;  %v1882_v12 = vld [vmem:[%s2407_s3] sm:$0xff]  }
 0x402   : > { %v1857_v50 = vpop.permute.xlu1 %1856  ;;  %v1847_v51 = vpop.permute.xlu0 %1846  ;;  %vm1042_vm3 = vcmp.ge.s32.totalorder %v1040_v45, 0 }
 0x403   : > { %v1859_v52 = vunpack.i.h.bf16 %v1857_v50  ;;  %v1858_v53 = vunpack.i.l.bf16 %v1857_v50  ;;  %v1849_v54 = vunpack.i.h.bf16 %v1847_v51  ;;  %v1848_v55 = vunpack.i.l.bf16 %v1847_v51  ;;  %vm1690_vm4 = vmpackc.low %vm1042_vm3, %vm1042_vm3 }
 0x405   : > { %v1136_v56 = vsel %vm1034_vm10, %v1843_v49, %v1848_v55  ;;  %v1137_v57 = vsel %vm1034_vm10, %v1844_v48, %v1849_v54  ;;  %v1160_v58 = vsel %vm1091_vm9, %v1858_v53, %v1853_v47  ;;  %v1161_v59 = vsel %vm1091_vm9, %v1859_v52, %v1854_v46 }
 0x406   : > { %v1867_v61 = vpop.permute.xlu1 %1866  ;;  %v1862_v62 = vpop.permute.xlu0 %1861  ;;  %v1145_v63 = vsel %vm1127_vm11, %v1136_v56, %v1962_v1  ;;  %v1147_v60 = vsel %vm1127_vm11, %v1137_v57, %v1967_v2  ;;  %v1167_v0 = vsel %vm1149_vm12, %v1160_v58, %v1962_v1  ;;  %v1169_v4 = vsel %vm1149_vm12, %v1161_v59, %v1967_v2 }
 0x407   : > { %v1171_v6 = vmax.f32 %v1145_v63, %v1167_v0  ;;  %v1173_v8 = vmax.f32 %v1147_v60, %v1169_v4  ;;  %v1138_v9 = vsel %vm1034_vm10, %v1848_v55, %v1843_v49  ;;  %v1139_v10 = vsel %vm1034_vm10, %v1849_v54, %v1844_v48 }
 0x408   : > { %v1869_v16 = vunpack.i.h.bf16 %v1867_v61  ;;  %v1868_v17 = vunpack.i.l.bf16 %v1867_v61  ;;  %v1864_v18 = vunpack.i.h.bf16 %v1862_v62  ;;  %v1863_v19 = vunpack.i.l.bf16 %v1862_v62 }
 0x409   : > { %v1175_v20 = vmax.f32 %v1962_v1, %v1171_v6  ;;  %v1177_v30 = vmax.f32 %v1967_v2, %v1173_v8  ;;  %v1144_v22 = vsel %vm1126_vm13, %v1138_v9, %v1972_v3  ;;  %v1146_v23 = vsel %vm1126_vm13, %v1139_v10, %v1979_v5 }
 0x40a   : > { %v1158_v24 = vsel %vm1091_vm9, %v1853_v47, %v1858_v53  ;;  %v1159_v25 = vsel %vm1091_vm9, %v1854_v46, %v1859_v52  ;;  %v1095_v31 = vsel %vm1091_vm9, %v1869_v16, %v1864_v18  ;;  %v1094_v27 = vsel %vm1091_vm9, %v1868_v17, %v1863_v19  ;;  %v1877_v29 = vpop.permute.xlu1 %1876  ;;  %v1872_v35 = vpop.permute.xlu0 %1871 }
 0x40b   : > { %v1683_v26 = vpack.c.bf16 %v1177_v30, %v1175_v20  ;;  %v1166_v1 = vsel %vm1148_vm14, %v1158_v24, %v1972_v3  ;;  %v1168_v2 = vsel %vm1148_vm14, %v1159_v25, %v1979_v5  ;;  %v1093_v38 = vsel %vm1091_vm9, %v1864_v18, %v1869_v16 }
 0x40c   : > { %v1170_v33 = vmax.f32 %v1144_v22, %v1166_v1  ;;  %v1172_v28 = vmax.f32 %v1146_v23, %v1168_v2  ;;  %v1092_v39 = vsel %vm1091_vm9, %v1863_v19, %v1868_v17  ;;  %v1685_v36 = vpack.c.bf16 %v1095_v31, %v1094_v27 }
 0x40d   : > { %1269 = vmatprep.subr.bf16.mxu0 %v1683_v26  ;;  %1714 = vmatprep.subr.bf16.mxu1 %v1683_v26  ;;  %v1879_v41 = vunpack.i.h.bf16 %v1877_v29  ;;  %v1878_v42 = vunpack.i.l.bf16 %v1877_v29  ;;  %v1874_v43 = vunpack.i.h.bf16 %v1872_v35  ;;  %v1873_v44 = vunpack.i.l.bf16 %v1872_v35 }
 0x40e   : > { %v1174_v37 = vmax.f32 %v1972_v3, %v1170_v33  ;;  %v1176_v34 = vmax.f32 %v1979_v5, %v1172_v28  ;;  %v1688_v46 = vpack.c.bf16 %v1093_v38, %v1092_v39  ;;  %v1679_v3 = vpack.c.bf16 %v2003_v15, %v1999_v13 }
 0x40f   : > { %v1036_v5 = vsel %vm1034_vm10, %v1874_v43, %v1879_v41  ;;  %v1035_v47 = vsel %vm1034_vm10, %v1873_v44, %v1878_v42  ;;  %v1039_v48 = vadd.s32 4294967295, %v1981_v7  ;;  %v1038_v49 = vsel %vm1034_vm10, %v1879_v41, %v1874_v43  ;;  %v1883_v7 = vld [vmem:[%s2407_s3 + $0x8] sm:$0xff]  }
 0x410   : > { %v1682_v40 = vpack.c.bf16 %v1176_v34, %v1174_v37  ;;  %v1037_v13 = vsel %vm1034_vm10, %v1878_v42, %v1873_v44  ;;  %v1691_v15 = vpack.c.bf16 %v1036_v5, %v1035_v47  ;;  %v1315_v47 = vld [vmem:[%s2408_s4 + $0x28] sm:$0xff] }
 0x411   : > { %vm1041_vm5 = vcmp.ge.s32.totalorder %v1039_v48, 0  ;;  %v1694_v50 = vpack.c.bf16 %v1038_v49, %v1037_v13  ;;  %v1316_v48 = vld [vmem:[%s2408_s4 + $0x30] sm:$0xff] }
 0x412   : > { %1270 = vmatpush1.bf16.msra.mxu0 %v1682_v40  ;;  %1718 = vmatpush1.bf16.msra.mxu1 %v1682_v40  ;;  %vm1693_vm6 = vmpackc.low %vm1041_vm5, %vm1041_vm5 }
 0x413   : > { %1686 = vmatprep.subr.msk.bf16.mxu0 %vm1684_vm1, %v1685_v36  ;;  %1715 = vmatprep.subr.msk.bf16.mxu1 %vm1684_vm1, %v1685_v36 }
 0x416   : > { %1689 = vmatpush1.bf16.msk.msra.mxu0 %vm1687_vm2, %v1688_v46  ;;  %1719 = vmatpush1.bf16.msk.msra.mxu1 %vm1687_vm2, %v1688_v46  ;;  %v1314_v46 = vld [vmem:[%s2408_s4 + $0x20] sm:$0xff] }
 0x417   : > { %1273 = vmatprep.subr.bf16.mxu0 %v1679_v3  ;;  %1716 = vmatprep.subr.bf16.mxu1 %v1679_v3 }
 0x41a   : > { %1274 = vmatpush1.bf16.msra.mxu0 %v1678_v11  ;;  %1720 = vmatpush1.bf16.msra.mxu1 %v1678_v11 }
 0x41b   : > { %1692 = vmatprep.subr.msk.bf16.mxu0 %vm1690_vm4, %v1691_v15  ;;  %1717 = vmatprep.subr.msk.bf16.mxu1 %vm1690_vm4, %v1691_v15 }
 0x41e   : > { %1695 = vmatpush1.bf16.msk.msra.mxu0 %vm1693_vm6, %v1694_v50  ;;  %1721 = vmatpush1.bf16.msk.msra.mxu1 %vm1693_vm6, %v1694_v50 }
 0x421   : > { %1579 = vmatmul.mubr.msk.bf16.vlgmr.msra.gmra.mxu0 %vm1254_vm7, %v1882_v12  ;;  %1580 = vmatmul.mubr.msk.bf16.vlgmr.msra.gmra.mxu1 %vm1254_vm7, %v1883_v7  ;;  %v1318_v12 = vld [vmem:[%s2409_s5 + $0x20] sm:$0xff] }
 0x4e1   : > { %v2321_v14 = vpop.f32.mrf.mxu0  ;;  %v2323_v51 = vpop.f32.mrf.mxu1 }
 0x4e2   : > { %v1334_v63 = vmul.f32 %v2321_v14, %v2321_v14  ;;  %v1338_v60 = vmul.f32 %v2323_v51, %v2323_v51 }
 0x4e3   : > { %v2325_v52 = vpop.f32.mrf.mxu0  ;;  %v2327_v53 = vpop.f32.mrf.mxu1 }
 0x4e4   : > { %v1322_v54 = vadd.f32 %v2325_v52, %v2321_v14  ;;  %v1328_v58 = vadd.f32 %v2327_v53, %v2323_v51  ;;  %v1335_v61 = vmul.f32 %v2325_v52, %v2325_v52  ;;  %v1339_v8 = vmul.f32 %v2327_v53, %v2327_v53 }
 0x4e5   : > { %v2331_v55 = vpop.f32.mrf.mxu0  ;;  %v2333_v56 = vpop.f32.mrf.mxu1 }
 0x4e6   : > { %1323 = vadd.xlane.f32.xlu0 %v1322_v54  ;;  %v1342_v4 = vadd.f32 %v1335_v61, %v1334_v63  ;;  %v1336_v9 = vmul.f32 %v2331_v55, %v2331_v55  ;;  %v1348_v17 = vadd.f32 %v1339_v8, %v1338_v60  ;;  %v1340_v18 = vmul.f32 %v2333_v56, %v2333_v56  ;;  %v1320_v63 = vld [vmem:[%s2409_s5 + $0x30] sm:$0xff] }
 0x4e7   : > { %v2335_v57 = vpop.f32.mrf.mxu0  ;;  %v2343_v62 = vpop.f32.mrf.mxu1 }
 0x4e8   : > { %v1325_v59 = vadd.f32 %v2335_v57, %v2331_v55  ;;  %v1337_v0 = vmul.f32 %v2335_v57, %v2335_v57  ;;  %v1331_v6 = vadd.f32 %v2343_v62, %v2333_v56  ;;  %v1341_v10 = vmul.f32 %v2343_v62, %v2343_v62 }
 0x4ea   : > { %1329 = vadd.xlane.f32.xlu0 %v1328_v58  ;;  %1326 = vadd.xlane.f32.xlu1 %v1325_v59  ;;  %v1345_v16 = vadd.f32 %v1337_v0, %v1336_v9  ;;  %v1351_v19 = vadd.f32 %v1341_v10, %v1340_v18  ;;  %v1317_v58 = vld [vmem:[%s2408_s4 + $0x38] sm:$0xff] }
 0x4eb   : > { %v1321_v9 = vld [vmem:[%s2409_s5 + $0x38] sm:$0xff] }
 0x4ee   : > { %1343 = vadd.xlane.f32.xlu0 %v1342_v4  ;;  %1332 = vadd.xlane.f32.xlu1 %v1331_v6  ;;  %v1319_v4 = vld [vmem:[%s2409_s5 + $0x28] sm:$0xff] }
 0x4f2   : > { %1346 = vadd.xlane.f32.xlu0 %v1345_v16  ;;  %1349 = vadd.xlane.f32.xlu1 %v1348_v17 }
 0x4f6   : > { %1352 = vadd.xlane.f32.xlu0 %v1351_v19 }
 0x56f   : > { %v1324_v20 = vpop.xlane.xlu0 %1323 }
 0x570   : > { %v1354_v21 = vmul.f32 0.00390625, %v1324_v20 }
 0x572   : > { %v1362_v26 = vmul.f32 %v1354_v21, %v1354_v21 }
 0x573   : > { %v1330_v30 = vpop.xlane.xlu0 %1329  ;;  %v1327_v32 = vpop.xlane.xlu1 %1326 }
 0x574   : > { %v1356_v22 = vmul.f32 0.00390625, %v1330_v30  ;;  %v1355_v23 = vmul.f32 0.00390625, %v1327_v32 }
 0x576   : > { %v1364_v31 = vmul.f32 %v1356_v22, %v1356_v22  ;;  %v1363_v27 = vmul.f32 %v1355_v23, %v1355_v23 }
 0x577   : > { %v1344_v24 = vpop.xlane.xlu0 %1343  ;;  %v1333_v25 = vpop.xlane.xlu1 %1332 }
 0x578   : > { %v1358_v1 = vmul.f32 0.00390625, %v1344_v24  ;;  %v1357_v35 = vmul.f32 0.00390625, %v1333_v25 }
 0x57a   : > { %v1366_v2 = vsub.f32 %v1358_v1, %v1362_v26  ;;  %v1365_v41 = vmul.f32 %v1357_v35, %v1357_v35 }
 0x57b   : > { %v1347_v33 = vpop.xlane.xlu0 %1346  ;;  %v1350_v28 = vpop.xlane.xlu1 %1349 }
 0x57c   : > { %v1370_v29 = vadd.f32 1e-05, %v1366_v2  ;;  %v1359_v37 = vmul.f32 0.00390625, %v1347_v33  ;;  %v1360_v34 = vmul.f32 0.00390625, %v1350_v28 }
 0x57e   : > { %1884 = vrsqrt.f32 %v1370_v29  ;;  %v1367_v38 = vsub.f32 %v1359_v37, %v1363_v27  ;;  %v1368_v39 = vsub.f32 %v1360_v34, %v1364_v31 }
 0x57f   : > { %v1353_v36 = vpop.xlane.xlu0 %1352 }
 0x580   : > { %v1371_v40 = vadd.f32 1e-05, %v1367_v38  ;;  %v1372_v42 = vadd.f32 1e-05, %v1368_v39  ;;  %v1361_v43 = vmul.f32 0.00390625, %v1353_v36 }
 0x582   : > { %1886 = vrsqrt.f32 %v1371_v40  ;;  %v1369_v44 = vsub.f32 %v1361_v43, %v1365_v41 }
 0x583   : > { %1888 = vrsqrt.f32 %v1372_v42 }
 0x584   : > { %v1373_v45 = vadd.f32 1e-05, %v1369_v44 }
 0x586   : > { %1890 = vrsqrt.f32 %v1373_v45 }
 0x58b   : > { %v1885_v3 = vpop.eup %1884 }
 0x58c   : > { %v1378_v5 = vmul.f32 %v1885_v3, %v1314_v46 }
 0x58e   : > { %1384 = vperm.xlu1 %1880, %v1378_v5   ;;  %v1410_v50 = vmul.f32 %v1378_v5, %v1354_v21 }
 0x58f   : > { %v1887_v11 = vpop.eup %1886 }
 0x590   : > { %v1889_v49 = vpop.eup %1888  ;;  %v1379_v13 = vmul.f32 %v1887_v11, %v1315_v47  ;;  %v1414_v7 = vsub.f32 %v1318_v12, %v1410_v50 }
 0x591   : > { %v1380_v15 = vmul.f32 %v1889_v49, %v1316_v48 }
 0x592   : > { %1389 = vperm.xlu0 %1881, %v1379_v13   ;;  %v1411_v0 = vmul.f32 %v1379_v13, %v1355_v23 }
 0x593   : > { %1394 = vperm.xlu1 %1880, %v1380_v15   ;;  %v1891_v54 = vpop.eup %1890  ;;  %v1412_v61 = vmul.f32 %v1380_v15, %v1356_v22 }
 0x594   : > { %v1381_v59 = vmul.f32 %v1891_v54, %v1317_v58  ;;  %v1415_v6 = vsub.f32 %v1319_v4, %v1411_v0 }
 0x595   : > { %v1416_v60 = vsub.f32 %v1320_v63, %v1412_v61 }
 0x596   : > { %v1413_v8 = vmul.f32 %v1381_v59, %v1357_v35 }
 0x597   : > { %1420 = vperm.xlu1 %1880, %v1414_v7  }
 0x598   : > { %v1417_v10 = vsub.f32 %v1321_v9, %v1413_v8 }
 0x59b   : > { %1399 = vperm.xlu1 %1880, %v1381_v59  }
 0x59f   : > { %1430 = vperm.xlu1 %1880, %v1416_v60  }
 0x5a3   : > { %1425 = vperm.xlu1 %1880, %v1415_v6  }
 0x5a7   : > { %1435 = vperm.xlu1 %1880, %v1417_v10  }
 0x609   : > { %v1385_v16 = vpop.permute.xlu1 %1384 }
 0x60a   : > { %v1402_v18 = vmul.f32 %v1385_v16, %v2321_v14  ;;  %v1403_v19 = vmul.f32 %v1385_v16, %v2325_v52 }
 0x60d   : > { %v1390_v24 = vpop.permute.xlu0 %1389 }
 0x60e   : > { %v1395_v17 = vpop.permute.xlu1 %1394  ;;  %v1404_v14 = vmul.f32 %v1390_v24, %v2331_v55  ;;  %v1405_v52 = vmul.f32 %v1390_v24, %v2335_v57 }
 0x60f   : > { %v1406_v26 = vmul.f32 %v1395_v17, %v2323_v51  ;;  %v1407_v1 = vmul.f32 %v1395_v17, %v2327_v53 }
 0x612   : > { %v1421_v20 = vpop.permute.xlu1 %1420 }
 0x613   : > { %v1438_v30 = vadd.f32 %v1421_v20, %v1402_v18  ;;  %v1439_v32 = vadd.f32 %v1421_v20, %v1403_v19 }
 0x615   : > { %v1446_v21 = vmax.f32 %v1438_v30, 0.0  ;;  %v1447_v22 = vmax.f32 %v1439_v32, 0.0 }
 0x616   : > { %v1400_v23 = vpop.permute.xlu1 %1399 }
 0x617   : > { %1454 = vst [vmem:[%s1992_s13] sm:$0xff] %v1446_v21  ;;  %1455 = vst [vmem:[%s1992_s13 + $0x8] sm:$0xff] %v1447_v22  ;;  %v1408_v29 = vmul.f32 %v1400_v23, %v2333_v56  ;;  %v1409_v51 = vmul.f32 %v1400_v23, %v2343_v62 }
 0x61a   : > { %v1431_v25 = vpop.permute.xlu1 %1430 }
 0x61b   : > { %v1442_v2 = vadd.f32 %v1431_v25, %v1406_v26  ;;  %v1443_v31 = vadd.f32 %v1431_v25, %v1407_v1 }
 0x61d   : > { %v1450_v37 = vmax.f32 %v1442_v2, 0.0  ;;  %v1451_v34 = vmax.f32 %v1443_v31, 0.0 }
 0x61e   : > { %v1426_v27 = vpop.permute.xlu1 %1425 }
 0x61f   : > { %v1440_v33 = vadd.f32 %v1426_v27, %v1404_v14  ;;  %v1441_v28 = vadd.f32 %v1426_v27, %v1405_v52  ;;  %1458 = vst [vmem:[%s1992_s13 + $0x20] sm:$0xff] %v1450_v37  ;;  %1459 = vst [vmem:[%s1992_s13 + $0x28] sm:$0xff] %v1451_v34 }
 0x621   : > { %v1448_v35 = vmax.f32 %v1440_v33, 0.0  ;;  %v1449_v53 = vmax.f32 %v1441_v28, 0.0 }
 0x622   : > { %v1436_v55 = vpop.permute.xlu1 %1435 }
 0x623   : > { %1456 = vst [vmem:[%s1992_s13 + $0x10] sm:$0xff] %v1448_v35  ;;  %1457 = vst [vmem:[%s1992_s13 + $0x18] sm:$0xff] %v1449_v53  ;;  %v1444_v57 = vadd.f32 %v1436_v55, %v1408_v29  ;;  %v1445_v38 = vadd.f32 %v1436_v55, %v1409_v51 }
 0x625   : > { %v1452_v39 = vmax.f32 %v1444_v57, 0.0  ;;  %v1453_v36 = vmax.f32 %v1445_v38, 0.0 }
 0x627   : > { %1460 = vst [vmem:[%s1992_s13 + $0x30] sm:$0xff] %v1452_v39  ;;  %1461 = vst [vmem:[%s1992_s13 + $0x38] sm:$0xff] %v1453_v36 }
 0x628 PF: > { %s16_s21 = sadd.s32 1, %s1898_s21  }
 0x629   : > { %p13_p6 = scmp.ge.s32.totalorder %s16_s21, 4  }
 0x62b   :  { %15 = sbr.rel (!%p13_p6) target bundleno = 1 (0x1), region = 79 }

</bundles_post_ra>
